<compile_context>
chip_gen: v6e
topology: v6e:2x2x1
jax: 0.10.0
libtpu: 0.0.40
codegen_flags: <defaults>
</compile_context>

<pallas_src>
import numpy as np
import jax
import jax.numpy as jnp
from jax.experimental import pallas as pl
from jax.experimental.pallas import tpu as pltpu
from jax.scipy.special import erf as _erf

# ----------------------------- config (small) -----------------------------
HEIGHT_FACTOR = 2
WIDTH_FACTOR = 2
PATCH = 4            # patch_size
MERGE = 2            # spatial_merge_size
TEMPORAL = 2         # temporal_patch_size
EMBED_DIM = 32
NUM_HEADS = 2
HEAD_DIM = EMBED_DIM // NUM_HEADS           # 16
HEAD_DIM_HALF = HEAD_DIM // 2               # 8
MLP_HIDDEN = 64
DEPTH = 2
FULLATT_BLOCK_INDEXES = [1]
MERGER_HIDDEN = EMBED_DIM * MERGE * MERGE   # 128
MERGER_OUT = 64
OUT_PAD = 128                               # lane-dense padded output width
S = HEIGHT_FACTOR * WIDTH_FACTOR * MERGE * MERGE              # factor_size = 16
NG = S // (MERGE * MERGE)                                      # merged groups = 4
IMAGE_RESIZE = (HEIGHT_FACTOR * MERGE * PATCH, WIDTH_FACTOR * MERGE * PATCH)  # (16,16)
EPS = 1e-6

VMEM_SPEC = lambda: pl.BlockSpec(memory_space=pltpu.MemorySpace.VMEM)


# ----------------------------- in-kernel helpers -----------------------------
def _rms(x, w):
    var = jnp.mean(x * x, axis=-1, keepdims=True)
    return (x * jax.lax.rsqrt(var + EPS)) * w


def _gelu_erf(x):
    # GELU(x) = 0.5*x*(1+erf(x/sqrt(2)))
    # TODO(synk): erf via Abramowitz-Stegun 7.1.26 polynomial (no native erf lowering in
    # Mosaic); max abs error ~1.5e-7 vs torch's exact-erf GELU.
    z = x * 0.7071067811865476
    az = jnp.abs(z)
    t = 1.0 / (1.0 + 0.3275911 * az)
    poly = t * (0.254829592 + t * (-0.284496736 + t * (1.421413741
               + t * (-1.453152027 + t * 1.061405429))))
    erf_abs = 1.0 - poly * jnp.exp(-az * az)
    e = jnp.where(z >= 0.0, erf_abs, -erf_abs)
    return 0.5 * x * (1.0 + e)


# ----------------------------- fused Pallas kernel -----------------------------
def _make_fused_kernel(mask_zero_flags):
    D = EMBED_DIM
    hd = HEAD_DIM
    nh = NUM_HEADS
    two_d = 2 * D
    four_d = 4 * D

    def kernel(x_ref, pw_ref,
               n1w_ref, wbig_ref, bbig_ref, projw_ref, projb_ref,
               n2w_ref, gw_ref, gb_ref, uw_ref, ub_ref, dw_ref, db_ref,
               cos_ref, sin_ref, mask_ref, lnq_ref,
               mw1_ref, mb1_ref, mw2_ref, mb2_ref, out_ref):
        # ---- patch embedding (Conv3d with stride==kernel == per-patch linear) ----
        h = jnp.dot(x_ref[...], pw_ref[...], preferred_element_type=jnp.float32)   # (S, D)

        cos2 = cos_ref[...]        # (S, 2D)  cos tiled over heads for [q | k]
        sin2 = sin_ref[...]        # (S, 2D)

        # ---- transformer blocks (static loop, activations stay resident) ----
        for l in range(DEPTH):
            hn = _rms(h, n1w_ref[l])
            # fused qkv + rotate_half sources: columns = [q | k | rot(q) | rot(k) | v]
            qkvr = jnp.dot(hn, wbig_ref[l], preferred_element_type=jnp.float32) + bbig_ref[l]
            qk = qkvr[:, :two_d]
            qkr = qkvr[:, two_d:four_d]
            v = qkvr[:, four_d:]
            qk_rot = qk * cos2 + qkr * sin2            # RoPE: 2 muls + 1 add

            heads = []
            for i in range(nh):                         # static per-head loop (nh == 2)
                qh = qk_rot[:, i * hd:(i + 1) * hd]
                kh = qk_rot[:, D + i * hd:D + (i + 1) * hd]
                vh = v[:, i * hd:(i + 1) * hd]
                s = jax.lax.dot_general(qh, kh, (((1,), (1,)), ((), ())),
                                        preferred_element_type=jnp.float32)   # (S, S)
                if not mask_zero_flags[l]:              # skip all-zero (full-attn) masks
                    s = s + mask_ref[l]
                m = jnp.max(s, axis=-1, keepdims=True)
                p = jnp.exp(s - m)
                attn = p * pl.reciprocal(jnp.sum(p, axis=-1, keepdims=True), approx=True)
                heads.append(jnp.dot(attn, vh, preferred_element_type=jnp.float32))
            o = jnp.concatenate(heads, axis=-1)                                 # (S, D)

            h = h + jnp.dot(o, projw_ref[l], preferred_element_type=jnp.float32) + projb_ref[l]

            # norm2 + SwiGLU MLP + residual
            hn2 = _rms(h, n2w_ref[l])
            gate = jnp.dot(hn2, gw_ref[l], preferred_element_type=jnp.float32) + gb_ref[l]
            up = jnp.dot(hn2, uw_ref[l], preferred_element_type=jnp.float32) + ub_ref[l]
            act = gate * jax.nn.sigmoid(gate)
            h = h + jnp.dot(act * up, dw_ref[l], preferred_element_type=jnp.float32) + db_ref[l]

        # ---- ln_q ----
        hn = _rms(h, lnq_ref[...])                                              # (S, D)

        # ---- spatial merge (S, D) -> (NG, 4D) done via selection matmuls:
        #      row g of the merged tensor = concat(hn[4g+0..4g+3]); equivalently
        #      Y1 = sum_j sel_j @ hn @ W1_chunk_j  with sel_j[g, r] = [r == 4g + j].
        r_idx = jax.lax.broadcasted_iota(jnp.int32, (NG, S), 1)
        g_idx = jax.lax.broadcasted_iota(jnp.int32, (NG, S), 0)
        y1 = jnp.zeros((NG, MERGER_HIDDEN), jnp.float32)
        for j in range(MERGE * MERGE):
            sel = (r_idx == g_idx * (MERGE * MERGE) + j).astype(jnp.float32)    # (NG, S)
            rows = jnp.dot(sel, hn, preferred_element_type=jnp.float32)         # (NG, D)
            y1 = y1 + jnp.dot(rows, mw1_ref[j], preferred_element_type=jnp.float32)
        y1 = y1 + mb1_ref[...]
        y1 = _gelu_erf(y1)
        # second merger linear, zero-padded to 128 output cols -> lane-dense store
        out_ref[...] = jnp.dot(y1, mw2_ref[...], preferred_element_type=jnp.float32) + mb2_ref[...]

    return kernel


def _build_fused_call(mask_zero_flags):
    kernel = _make_fused_kernel(tuple(bool(f) for f in mask_zero_flags))
    n_inputs = 22
    return pl.pallas_call(
        kernel,
        out_shape=jax.ShapeDtypeStruct((NG, OUT_PAD), jnp.float32),
        in_specs=[VMEM_SPEC() for _ in range(n_inputs)],
        out_specs=VMEM_SPEC(),
    )


# ----------------------------- init-time helpers -----------------------------
def rot_pos_emb_cos_sin():
    """Qwen2.5-VL vision 2D rotary embedding for grid_thw=[1, HF*merge, WF*merge]."""
    dim = HEAD_DIM // 2
    theta = 10000.0
    inv_freq = 1.0 / (theta ** (np.arange(0, dim, 2, dtype=np.float32) / dim))
    h = HEIGHT_FACTOR * MERGE
    w = WIDTH_FACTOR * MERGE
    hpos = np.broadcast_to(np.arange(h)[:, None], (h, w)).copy()
    wpos = np.broadcast_to(np.arange(w)[None, :], (h, w)).copy()
    hpos = hpos.reshape(h // MERGE, MERGE, w // MERGE, MERGE).transpose(0, 2, 1, 3).reshape(-1)
    wpos = wpos.reshape(h // MERGE, MERGE, w // MERGE, MERGE).transpose(0, 2, 1, 3).reshape(-1)
    max_grid = max(h, w)
    freqs = np.outer(np.arange(max_grid, dtype=np.float32), inv_freq)
    pos_ids = np.stack([hpos, wpos], axis=-1)
    emb = freqs[pos_ids].reshape(S, dim)
    cos = np.concatenate([np.cos(emb), np.cos(emb)], axis=-1)      # (S, head_dim)
    sin = np.concatenate([np.sin(emb), np.sin(emb)], axis=-1)
    return jnp.asarray(cos, jnp.float32), jnp.asarray(sin, jnp.float32)


def build_attention_masks():
    """Per-layer additive masks with the cumulative in-place construction of the reference.
    # TODO(synk): get_window_index window ordering approximated by equal merge**2 windows."""
    cu_full = [0, S]
    cu_window = list(range(0, S + 1, MERGE * MERGE))
    mask_int = np.ones((S, S), dtype=np.int8)
    masks, zero_flags = [], []
    for layer in range(DEPTH):
        cu = cu_full if layer in FULLATT_BLOCK_INDEXES else cu_window
        for i in range(1, len(cu)):
            mask_int[cu[i - 1]:cu[i], cu[i - 1]:cu[i]] = 0
        m = mask_int.astype(np.float32) * -128.0
        zero_flags.append(bool(not np.any(m)))
        masks.append(jnp.asarray(m))
    return masks, zero_flags


def bilinear_resize_align_corners(x, out_h, out_w):
    """torch.nn.functional.interpolate(mode='bilinear', align_corners=True) for NCHW."""
    _, _, H, W = x.shape
    ys = jnp.linspace(0.0, H - 1.0, out_h)
    xs = jnp.linspace(0.0, W - 1.0, out_w)
    y0 = jnp.floor(ys).astype(jnp.int32)
    x0 = jnp.floor(xs).astype(jnp.int32)
    y1 = jnp.minimum(y0 + 1, H - 1)
    x1 = jnp.minimum(x0 + 1, W - 1)
    wy = (ys - y0.astype(jnp.float32))[None, None, :, None]
    wx = (xs - x0.astype(jnp.float32))[None, None, None, :]
    top = x[:, :, y0, :] * (1.0 - wy) + x[:, :, y1, :] * wy
    return top[:, :, :, x0] * (1.0 - wx) + top[:, :, :, x1] * wx


def init_raw_params(key):
    def nrm(k, shape, scale=0.02):
        return jax.random.normal(k, shape, dtype=jnp.float32) * scale

    keys = jax.random.split(key, 4 + DEPTH)
    params = {"patch_w": nrm(keys[0], (EMBED_DIM, 3 * TEMPORAL * PATCH * PATCH))}
    scale_factor = float(HEAD_DIM ** (-0.25))

    blocks = []
    for l in range(DEPTH):
        bk = jax.random.split(keys[4 + l], 8)
        qkv_w = nrm(bk[0], (3 * EMBED_DIM, EMBED_DIM))
        qkv_b = nrm(bk[1], (1, 3 * EMBED_DIM))
        # scale q,k rows (everything except the last embed_dim rows) — as in module __init__
        qkv_w = qkv_w.at[:-EMBED_DIM].multiply(scale_factor)
        qkv_b = qkv_b.at[:, :-EMBED_DIM].multiply(scale_factor)
        blocks.append(dict(
            norm1_w=jnp.ones((1, EMBED_DIM), jnp.float32),
            norm2_w=jnp.ones((1, EMBED_DIM), jnp.float32),
            qkv_w=qkv_w, qkv_b=qkv_b,
            proj_w=nrm(bk[2], (EMBED_DIM, EMBED_DIM)),
            proj_b=nrm(bk[3], (1, EMBED_DIM)),
            gate_w=nrm(bk[4], (MLP_HIDDEN, EMBED_DIM)),
            gate_b=jnp.zeros((1, MLP_HIDDEN), jnp.float32),
            up_w=nrm(bk[5], (MLP_HIDDEN, EMBED_DIM)),
            up_b=jnp.zeros((1, MLP_HIDDEN), jnp.float32),
            down_w=nrm(bk[6], (EMBED_DIM, MLP_HIDDEN)),
            down_b=jnp.zeros((1, EMBED_DIM), jnp.float32),
        ))
    params["blocks"] = blocks
    params["ln_q_w"] = jnp.ones((1, EMBED_DIM), jnp.float32)
    mk = jax.random.split(keys[1], 4)
    params["merger_w1"] = nrm(mk[0], (MERGER_HIDDEN, MERGER_HIDDEN))
    params["merger_b1"] = nrm(mk[1], (1, MERGER_HIDDEN))
    params["merger_w2"] = nrm(mk[2], (MERGER_OUT, MERGER_HIDDEN))
    params["merger_b2"] = nrm(mk[3], (1, MERGER_OUT))
    return params


def pack_params(raw, cos, sin, masks):
    """Pre-transpose / fold weights into the layouts the fused kernel consumes."""
    D, nh, hd, half = EMBED_DIM, NUM_HEADS, HEAD_DIM, HEAD_DIM_HALF

    def rot_out_rows(w):     # w: (D, in), out-rows grouped per head -> rotate_half on out rows
        w4 = w.reshape(nh, hd, -1)
        return jnp.concatenate([-w4[:, half:], w4[:, :half]], axis=1).reshape(w.shape)

    def rot_last(b):         # b: (1, D)
        b3 = b.reshape(1, nh, hd)
        return jnp.concatenate([-b3[..., half:], b3[..., :half]], axis=-1).reshape(b.shape)

    n1w, wbig, bbig, projw, projb, n2w = [], [], [], [], [], []
    gw, gb, uw, ub, dw, db = [], [], [], [], [], []
    for p in raw["blocks"]:
        Wq, Wk, Wv = p["qkv_w"][:D], p["qkv_w"][D:2 * D], p["qkv_w"][2 * D:]
        bq, bk, bv = p["qkv_b"][:, :D], p["qkv_b"][:, D:2 * D], p["qkv_b"][:, 2 * D:]
        Wqr, Wkr = rot_out_rows(Wq), rot_out_rows(Wk)
        bqr, bkr = rot_last(bq), rot_last(bk)
        # column order: [q | k | rot(q) | rot(k) | v]
        wbig.append(jnp.concatenate([Wq, Wk, Wqr, Wkr, Wv], axis=0).T)   # (D, 5D)
        bbig.append(jnp.concatenate([bq, bk, bqr, bkr, bv], axis=1))     # (1, 5D)
        n1w.append(p["norm1_w"]); n2w.append(p["norm2_w"])
        projw.append(p["proj_w"].T); projb.append(p["proj_b"])
        gw.append(p["gate_w"].T); gb.append(p["gate_b"])
        uw.append(p["up_w"].T); ub.append(p["up_b"])
        dw.append(p["down_w"].T); db.append(p["down_b"])

    w1t = raw["merger_w1"].T                                             # (4D, 128)
    mw1 = jnp.stack([w1t[j * D:(j + 1) * D] for j in range(MERGE * MERGE)])  # (4, D, 128)
    w2t = raw["merger_w2"].T                                             # (128, 64)
    mw2 = jnp.concatenate([w2t, jnp.zeros((MERGER_HIDDEN, OUT_PAD - MERGER_OUT), jnp.float32)], 1)
    mb2 = jnp.concatenate([raw["merger_b2"],
                           jnp.zeros((1, OUT_PAD - MERGER_OUT), jnp.float32)], 1)

    return dict(
        patch_w_t=raw["patch_w"].T,
        n1w=jnp.stack(n1w), wbig=jnp.stack(wbig), bbig=jnp.stack(bbig),
        projw=jnp.stack(projw), projb=jnp.stack(projb), n2w=jnp.stack(n2w),
        gw=jnp.stack(gw), gb=jnp.stack(gb), uw=jnp.stack(uw), ub=jnp.stack(ub),
        dw=jnp.stack(dw), db=jnp.stack(db),
        cos2=jnp.tile(cos, (1, 2 * nh)), sin2=jnp.tile(sin, (1, 2 * nh)),
        masks=jnp.stack(masks),
        lnq=raw["ln_q_w"],
        mw1=mw1, mb1=raw["merger_b1"], mw2=mw2, mb2=mb2,
    )


# ----------------------------- preprocessing glue + forward -----------------------------
MEANS = jnp.asarray([0.48145466, 0.4578275, 0.40821073], jnp.float32).reshape(1, 3, 1, 1)
INV_STD = jnp.asarray([1.0 / 0.26862954, 1.0 / 0.26130258, 1.0 / 0.27577711],
                      jnp.float32).reshape(1, 3, 1, 1)
MEANS_INV_STD = MEANS * INV_STD
INV_255_STD = INV_STD / 255.0


def _preprocess(pixel_values):
    x = bilinear_resize_align_corners(pixel_values.astype(jnp.float32), *IMAGE_RESIZE)
    x = x * INV_255_STD - MEANS_INV_STD                     # (1,3,H,W)
    x = jnp.concatenate([x, x], axis=0)                     # (T,3,H,W)
    x = x.reshape(TEMPORAL, 3, HEIGHT_FACTOR, MERGE, PATCH, WIDTH_FACTOR, MERGE, PATCH)
    x = jnp.transpose(x, (2, 5, 3, 6, 1, 0, 4, 7))          # (HF,WF,M,M,3,T,P,P)
    return x.reshape(S, 3 * TEMPORAL * PATCH * PATCH)       # patch rows, row-major == torch


def make_forward(mask_zero_flags):
    fused = _build_fused_call(mask_zero_flags)

    @jax.jit
    def forward(pixel_values, fp):
        x = _preprocess(pixel_values)
        out_pad = fused(x, fp["patch_w_t"],
                        fp["n1w"], fp["wbig"], fp["bbig"], fp["projw"], fp["projb"],
                        fp["n2w"], fp["gw"], fp["gb"], fp["uw"], fp["ub"], fp["dw"], fp["db"],
                        fp["cos2"], fp["sin2"], fp["masks"], fp["lnq"],
                        fp["mw1"], fp["mb1"], fp["mw2"], fp["mb2"])
        return out_pad[:, :MERGER_OUT].reshape(1, NG, MERGER_OUT)

    return forward


# ----------------------------- plain-JAX reference (for validation) -----------------------------
def reference_forward(pixel_values, raw, cos, sin, masks):
    D, nh, hd, half = EMBED_DIM, NUM_HEADS, HEAD_DIM, HEAD_DIM_HALF

    def rms(x, w):
        return w * (x / jnp.sqrt(jnp.mean(x * x, axis=-1, keepdims=True) + EPS))

    def rot(t):
        return jnp.concatenate([-t[..., half:], t[..., :half]], axis=-1)

    x = _preprocess(pixel_values)
    h = x @ raw["patch_w"].T
    for l in range(DEPTH):
        p = raw["blocks"][l]
        hn = rms(h, p["norm1_w"])
        qkv = hn @ p["qkv_w"].T + p["qkv_b"]
        q = qkv[:, :D].reshape(S, nh, hd)
        k = qkv[:, D:2 * D].reshape(S, nh, hd)
        v = qkv[:, 2 * D:].reshape(S, nh, hd)
        q = q * cos[:, None, :] + rot(q) * sin[:, None, :]
        k = k * cos[:, None, :] + rot(k) * sin[:, None, :]
        q, k, v = q.transpose(1, 0, 2), k.transpose(1, 0, 2), v.transpose(1, 0, 2)
        scores = jnp.einsum('hqd,hkd->hqk', q, k) + masks[l][None]
        attn = jax.nn.softmax(scores, axis=-1)
        o = jnp.einsum('hqk,hkd->hqd', attn, v).transpose(1, 0, 2).reshape(S, D)
        h = h + o @ p["proj_w"].T + p["proj_b"]
        hn2 = rms(h, p["norm2_w"])
        gate = hn2 @ p["gate_w"].T + p["gate_b"]
        up = hn2 @ p["up_w"].T + p["up_b"]
        h = h + (gate * jax.nn.sigmoid(gate) * up) @ p["down_w"].T + p["down_b"]
    hn = rms(h, raw["ln_q_w"]).reshape(NG, MERGER_HIDDEN)
    y = hn @ raw["merger_w1"].T + raw["merger_b1"]
    y = 0.5 * y * (1.0 + _erf(y / jnp.sqrt(2.0)))
    out = y @ raw["merger_w2"].T + raw["merger_b2"]
    return out.reshape(1, NG, MERGER_OUT)


# ----------------------------- main -----------------------------
if __name__ == "__main__":
    key = jax.random.PRNGKey(0)
    k_img, k_par = jax.random.split(key)
    pixel_values = jax.random.uniform(k_img, (1, 3, 12, 12), dtype=jnp.float32,
                                      minval=0.0, maxval=255.0)
    raw = init_raw_params(k_par)
    cos, sin = rot_pos_emb_cos_sin()
    masks, mask_zero_flags = build_attention_masks()
    packed = pack_params(raw, cos, sin, masks)

    forward = make_forward(mask_zero_flags)
    out = jax.block_until_ready(forward(pixel_values, packed))
    ref = jax.block_until_ready(reference_forward(pixel_values, raw, cos, sin, masks))

    assert out.shape == (1, NG, MERGER_OUT)
    assert bool(jnp.all(jnp.isfinite(out)))
    max_err = float(jnp.max(jnp.abs(out - ref)))
    assert max_err < 2e-3, f"kernel vs reference mismatch: max abs err = {max_err}"
    print("KERNEL_OK")
</pallas_src>

<mosaic_0001>
module attributes {stable_mosaic.version = 11 : i64} {
  func.func @kernel(%arg0: memref<16x96xf32, #tpu.memory_space<vmem>>, %arg1: memref<96x32xf32, #tpu.memory_space<vmem>>, %arg2: memref<2x1x32xf32, #tpu.memory_space<vmem>>, %arg3: memref<2x32x160xf32, #tpu.memory_space<vmem>>, %arg4: memref<2x1x160xf32, #tpu.memory_space<vmem>>, %arg5: memref<2x32x32xf32, #tpu.memory_space<vmem>>, %arg6: memref<2x1x32xf32, #tpu.memory_space<vmem>>, %arg7: memref<2x1x32xf32, #tpu.memory_space<vmem>>, %arg8: memref<2x32x64xf32, #tpu.memory_space<vmem>>, %arg9: memref<2x1x64xf32, #tpu.memory_space<vmem>>, %arg10: memref<2x32x64xf32, #tpu.memory_space<vmem>>, %arg11: memref<2x1x64xf32, #tpu.memory_space<vmem>>, %arg12: memref<2x64x32xf32, #tpu.memory_space<vmem>>, %arg13: memref<2x1x32xf32, #tpu.memory_space<vmem>>, %arg14: memref<16x64xf32, #tpu.memory_space<vmem>>, %arg15: memref<16x64xf32, #tpu.memory_space<vmem>>, %arg16: memref<2x16x16xf32, #tpu.memory_space<vmem>>, %arg17: memref<1x32xf32, #tpu.memory_space<vmem>>, %arg18: memref<4x32x128xf32, #tpu.memory_space<vmem>>, %arg19: memref<1x128xf32, #tpu.memory_space<vmem>>, %arg20: memref<128x128xf32, #tpu.memory_space<vmem>>, %arg21: memref<1x128xf32, #tpu.memory_space<vmem>>, %arg22: memref<4x128xf32, #tpu.memory_space<vmem>>) attributes {dimension_semantics = [], scalar_prefetch = 0 : i64, scratch_operands = 0 : i64, tpu.core_type = #tpu.core_type<tc>} {
    %c0 = arith.constant 0 : index
    %c0_0 = arith.constant 0 : index
    %0 = vector.load %arg0[%c0, %c0_0] : memref<16x96xf32, #tpu.memory_space<vmem>>, vector<16x96xf32>
    %c0_1 = arith.constant 0 : index
    %c0_2 = arith.constant 0 : index
    %1 = vector.load %arg1[%c0_1, %c0_2] : memref<96x32xf32, #tpu.memory_space<vmem>>, vector<96x32xf32>
    %cst = arith.constant dense<0.000000e+00> : vector<16x32xf32>
    %2 = tpu.matmul %0, %1, %cst {dimension_numbers = #tpu.dot_dimension_numbers<[1], [0], [0], [1], [0, 0, 1, 1], [], []>} : vector<16x96xf32>, vector<96x32xf32>, vector<16x32xf32> -> vector<16x32xf32>
    %c0_3 = arith.constant 0 : index
    %c0_4 = arith.constant 0 : index
    %3 = vector.load %arg14[%c0_3, %c0_4] : memref<16x64xf32, #tpu.memory_space<vmem>>, vector<16x64xf32>
    %c0_5 = arith.constant 0 : index
    %c0_6 = arith.constant 0 : index
    %4 = vector.load %arg15[%c0_5, %c0_6] : memref<16x64xf32, #tpu.memory_space<vmem>>, vector<16x64xf32>
    %c0_7 = arith.constant 0 : index
    %c0_8 = arith.constant 0 : index
    %c0_9 = arith.constant 0 : index
    %5 = vector.load %arg2[%c0_7, %c0_8, %c0_9] : memref<2x1x32xf32, #tpu.memory_space<vmem>>, vector<1x1x32xf32>
    %6 = vector.shape_cast %5 : vector<1x1x32xf32> to vector<1x32xf32>
    %7 = arith.mulf %2, %2 : vector<16x32xf32>
    %cst_10 = arith.constant dense<0.000000e+00> : vector<16xf32>
    %8 = vector.multi_reduction <add>, %7, %cst_10 [1] : vector<16x32xf32> to vector<16xf32>
    %9 = vector.shape_cast %8 : vector<16xf32> to vector<16x1xf32>
    %cst_11 = arith.constant 3.200000e+01 : f32
    %10 = vector.broadcast %cst_11 : f32 to vector<16x1xf32>
    %11 = arith.divf %9, %10 : vector<16x1xf32>
    %cst_12 = arith.constant 9.99999997E-7 : f32
    %12 = vector.broadcast %cst_12 : f32 to vector<16x1xf32>
    %13 = arith.addf %11, %12 : vector<16x1xf32>
    %14 = math.rsqrt %13 : vector<16x1xf32>
    %15 = vector.broadcast %14 : vector<16x1xf32> to vector<16x32xf32>
    %16 = arith.mulf %2, %15 : vector<16x32xf32>
    %17 = vector.broadcast %6 : vector<1x32xf32> to vector<16x32xf32>
    %18 = arith.mulf %16, %17 : vector<16x32xf32>
    %c0_13 = arith.constant 0 : index
    %c0_14 = arith.constant 0 : index
    %c0_15 = arith.constant 0 : index
    %19 = vector.load %arg3[%c0_13, %c0_14, %c0_15] : memref<2x32x160xf32, #tpu.memory_space<vmem>>, vector<1x32x160xf32>
    %20 = vector.shape_cast %19 : vector<1x32x160xf32> to vector<32x160xf32>
    %cst_16 = arith.constant dense<0.000000e+00> : vector<16x160xf32>
    %21 = tpu.matmul %18, %20, %cst_16 {dimension_numbers = #tpu.dot_dimension_numbers<[1], [0], [0], [1], [0, 0, 1, 1], [], []>} : vector<16x32xf32>, vector<32x160xf32>, vector<16x160xf32> -> vector<16x160xf32>
    %c0_17 = arith.constant 0 : index
    %c0_18 = arith.constant 0 : index
    %c0_19 = arith.constant 0 : index
    %22 = vector.load %arg4[%c0_17, %c0_18, %c0_19] : memref<2x1x160xf32, #tpu.memory_space<vmem>>, vector<1x1x160xf32>
    %23 = vector.shape_cast %22 : vector<1x1x160xf32> to vector<1x160xf32>
    %24 = vector.broadcast %23 : vector<1x160xf32> to vector<16x160xf32>
    %25 = arith.addf %21, %24 : vector<16x160xf32>
    %26 = vector.extract_strided_slice %25 {offsets = [0, 0], sizes = [16, 64], strides = [1, 1]} : vector<16x160xf32> to vector<16x64xf32>
    %27 = vector.extract_strided_slice %25 {offsets = [0, 64], sizes = [16, 64], strides = [1, 1]} : vector<16x160xf32> to vector<16x64xf32>
    %28 = vector.extract_strided_slice %25 {offsets = [0, 128], sizes = [16, 32], strides = [1, 1]} : vector<16x160xf32> to vector<16x32xf32>
    %29 = arith.mulf %26, %3 : vector<16x64xf32>
    %30 = arith.mulf %27, %4 : vector<16x64xf32>
    %31 = arith.addf %29, %30 : vector<16x64xf32>
    %32 = vector.extract_strided_slice %31 {offsets = [0, 0], sizes = [16, 16], strides = [1, 1]} : vector<16x64xf32> to vector<16x16xf32>
    %33 = vector.extract_strided_slice %31 {offsets = [0, 32], sizes = [16, 16], strides = [1, 1]} : vector<16x64xf32> to vector<16x16xf32>
    %34 = vector.extract_strided_slice %28 {offsets = [0, 0], sizes = [16, 16], strides = [1, 1]} : vector<16x32xf32> to vector<16x16xf32>
    %cst_20 = arith.constant dense<0.000000e+00> : vector<16x16xf32>
    %35 = tpu.matmul %32, %33, %cst_20 {dimension_numbers = #tpu.dot_dimension_numbers<[1], [1], [0], [0], [0, 0, 1, 0], [], []>} : vector<16x16xf32>, vector<16x16xf32>, vector<16x16xf32> -> vector<16x16xf32>
    %c0_21 = arith.constant 0 : index
    %c0_22 = arith.constant 0 : index
    %c0_23 = arith.constant 0 : index
    %36 = vector.load %arg16[%c0_21, %c0_22, %c0_23] : memref<2x16x16xf32, #tpu.memory_space<vmem>>, vector<1x16x16xf32>
    %37 = vector.shape_cast %36 : vector<1x16x16xf32> to vector<16x16xf32>
    %38 = arith.addf %35, %37 : vector<16x16xf32>
    %cst_24 = arith.constant dense<0xFF800000> : vector<16xf32>
    %39 = vector.multi_reduction <maximumf>, %38, %cst_24 [1] : vector<16x16xf32> to vector<16xf32>
    %40 = vector.shape_cast %39 : vector<16xf32> to vector<16x1xf32>
    %41 = vector.broadcast %40 : vector<16x1xf32> to vector<16x16xf32>
    %42 = arith.subf %38, %41 : vector<16x16xf32>
    %43 = math.exp %42 : vector<16x16xf32>
    %cst_25 = arith.constant dense<0.000000e+00> : vector<16xf32>
    %44 = vector.multi_reduction <add>, %43, %cst_25 [1] : vector<16x16xf32> to vector<16xf32>
    %45 = vector.shape_cast %44 : vector<16xf32> to vector<16x1xf32>
    %46 = tpu.reciprocal %45 {approx = true} : vector<16x1xf32> -> vector<16x1xf32>
    %47 = vector.broadcast %46 : vector<16x1xf32> to vector<16x16xf32>
    %48 = arith.mulf %43, %47 : vector<16x16xf32>
    %cst_26 = arith.constant dense<0.000000e+00> : vector<16x16xf32>
    %49 = tpu.matmul %48, %34, %cst_26 {dimension_numbers = #tpu.dot_dimension_numbers<[1], [0], [0], [1], [0, 0, 1, 1], [], []>} : vector<16x16xf32>, vector<16x16xf32>, vector<16x16xf32> -> vector<16x16xf32>
    %50 = vector.extract_strided_slice %31 {offsets = [0, 16], sizes = [16, 16], strides = [1, 1]} : vector<16x64xf32> to vector<16x16xf32>
    %51 = vector.extract_strided_slice %31 {offsets = [0, 48], sizes = [16, 16], strides = [1, 1]} : vector<16x64xf32> to vector<16x16xf32>
    %52 = vector.extract_strided_slice %28 {offsets = [0, 16], sizes = [16, 16], strides = [1, 1]} : vector<16x32xf32> to vector<16x16xf32>
    %cst_27 = arith.constant dense<0.000000e+00> : vector<16x16xf32>
    %53 = tpu.matmul %50, %51, %cst_27 {dimension_numbers = #tpu.dot_dimension_numbers<[1], [1], [0], [0], [0, 0, 1, 0], [], []>} : vector<16x16xf32>, vector<16x16xf32>, vector<16x16xf32> -> vector<16x16xf32>
    %c0_28 = arith.constant 0 : index
    %c0_29 = arith.constant 0 : index
    %c0_30 = arith.constant 0 : index
    %54 = vector.load %arg16[%c0_28, %c0_29, %c0_30] : memref<2x16x16xf32, #tpu.memory_space<vmem>>, vector<1x16x16xf32>
    %55 = vector.shape_cast %54 : vector<1x16x16xf32> to vector<16x16xf32>
    %56 = arith.addf %53, %55 : vector<16x16xf32>
    %cst_31 = arith.constant dense<0xFF800000> : vector<16xf32>
    %57 = vector.multi_reduction <maximumf>, %56, %cst_31 [1] : vector<16x16xf32> to vector<16xf32>
    %58 = vector.shape_cast %57 : vector<16xf32> to vector<16x1xf32>
    %59 = vector.broadcast %58 : vector<16x1xf32> to vector<16x16xf32>
    %60 = arith.subf %56, %59 : vector<16x16xf32>
    %61 = math.exp %60 : vector<16x16xf32>
    %cst_32 = arith.constant dense<0.000000e+00> : vector<16xf32>
    %62 = vector.multi_reduction <add>, %61, %cst_32 [1] : vector<16x16xf32> to vector<16xf32>
    %63 = vector.shape_cast %62 : vector<16xf32> to vector<16x1xf32>
    %64 = tpu.reciprocal %63 {approx = true} : vector<16x1xf32> -> vector<16x1xf32>
    %65 = vector.broadcast %64 : vector<16x1xf32> to vector<16x16xf32>
    %66 = arith.mulf %61, %65 : vector<16x16xf32>
    %cst_33 = arith.constant dense<0.000000e+00> : vector<16x16xf32>
    %67 = tpu.matmul %66, %52, %cst_33 {dimension_numbers = #tpu.dot_dimension_numbers<[1], [0], [0], [1], [0, 0, 1, 1], [], []>} : vector<16x16xf32>, vector<16x16xf32>, vector<16x16xf32> -> vector<16x16xf32>
    %68 = tpu.concatenate %49, %67 in 1 : vector<16x16xf32>, vector<16x16xf32> -> vector<16x32xf32>
    %c0_34 = arith.constant 0 : index
    %c0_35 = arith.constant 0 : index
    %c0_36 = arith.constant 0 : index
    %69 = vector.load %arg5[%c0_34, %c0_35, %c0_36] : memref<2x32x32xf32, #tpu.memory_space<vmem>>, vector<1x32x32xf32>
    %70 = vector.shape_cast %69 : vector<1x32x32xf32> to vector<32x32xf32>
    %cst_37 = arith.constant dense<0.000000e+00> : vector<16x32xf32>
    %71 = tpu.matmul %68, %70, %cst_37 {dimension_numbers = #tpu.dot_dimension_numbers<[1], [0], [0], [1], [0, 0, 1, 1], [], []>} : vector<16x32xf32>, vector<32x32xf32>, vector<16x32xf32> -> vector<16x32xf32>
    %72 = arith.addf %2, %71 : vector<16x32xf32>
    %c0_38 = arith.constant 0 : index
    %c0_39 = arith.constant 0 : index
    %c0_40 = arith.constant 0 : index
    %73 = vector.load %arg6[%c0_38, %c0_39, %c0_40] : memref<2x1x32xf32, #tpu.memory_space<vmem>>, vector<1x1x32xf32>
    %74 = vector.shape_cast %73 : vector<1x1x32xf32> to vector<1x32xf32>
    %75 = vector.broadcast %74 : vector<1x32xf32> to vector<16x32xf32>
    %76 = arith.addf %72, %75 : vector<16x32xf32>
    %c0_41 = arith.constant 0 : index
    %c0_42 = arith.constant 0 : index
    %c0_43 = arith.constant 0 : index
    %77 = vector.load %arg7[%c0_41, %c0_42, %c0_43] : memref<2x1x32xf32, #tpu.memory_space<vmem>>, vector<1x1x32xf32>
    %78 = vector.shape_cast %77 : vector<1x1x32xf32> to vector<1x32xf32>
    %79 = arith.mulf %76, %76 : vector<16x32xf32>
    %cst_44 = arith.constant dense<0.000000e+00> : vector<16xf32>
    %80 = vector.multi_reduction <add>, %79, %cst_44 [1] : vector<16x32xf32> to vector<16xf32>
    %81 = vector.shape_cast %80 : vector<16xf32> to vector<16x1xf32>
    %cst_45 = arith.constant 3.200000e+01 : f32
    %82 = vector.broadcast %cst_45 : f32 to vector<16x1xf32>
    %83 = arith.divf %81, %82 : vector<16x1xf32>
    %cst_46 = arith.constant 9.99999997E-7 : f32
    %84 = vector.broadcast %cst_46 : f32 to vector<16x1xf32>
    %85 = arith.addf %83, %84 : vector<16x1xf32>
    %86 = math.rsqrt %85 : vector<16x1xf32>
    %87 = vector.broadcast %86 : vector<16x1xf32> to vector<16x32xf32>
    %88 = arith.mulf %76, %87 : vector<16x32xf32>
    %89 = vector.broadcast %78 : vector<1x32xf32> to vector<16x32xf32>
    %90 = arith.mulf %88, %89 : vector<16x32xf32>
    %c0_47 = arith.constant 0 : index
    %c0_48 = arith.constant 0 : index
    %c0_49 = arith.constant 0 : index
    %91 = vector.load %arg8[%c0_47, %c0_48, %c0_49] : memref<2x32x64xf32, #tpu.memory_space<vmem>>, vector<1x32x64xf32>
    %92 = vector.shape_cast %91 : vector<1x32x64xf32> to vector<32x64xf32>
    %cst_50 = arith.constant dense<0.000000e+00> : vector<16x64xf32>
    %93 = tpu.matmul %90, %92, %cst_50 {dimension_numbers = #tpu.dot_dimension_numbers<[1], [0], [0], [1], [0, 0, 1, 1], [], []>} : vector<16x32xf32>, vector<32x64xf32>, vector<16x64xf32> -> vector<16x64xf32>
    %c0_51 = arith.constant 0 : index
    %c0_52 = arith.constant 0 : index
    %c0_53 = arith.constant 0 : index
    %94 = vector.load %arg9[%c0_51, %c0_52, %c0_53] : memref<2x1x64xf32, #tpu.memory_space<vmem>>, vector<1x1x64xf32>
    %95 = vector.shape_cast %94 : vector<1x1x64xf32> to vector<1x64xf32>
    %96 = vector.broadcast %95 : vector<1x64xf32> to vector<16x64xf32>
    %97 = arith.addf %93, %96 : vector<16x64xf32>
    %c0_54 = arith.constant 0 : index
    %c0_55 = arith.constant 0 : index
    %c0_56 = arith.constant 0 : index
    %98 = vector.load %arg10[%c0_54, %c0_55, %c0_56] : memref<2x32x64xf32, #tpu.memory_space<vmem>>, vector<1x32x64xf32>
    %99 = vector.shape_cast %98 : vector<1x32x64xf32> to vector<32x64xf32>
    %cst_57 = arith.constant dense<0.000000e+00> : vector<16x64xf32>
    %100 = tpu.matmul %90, %99, %cst_57 {dimension_numbers = #tpu.dot_dimension_numbers<[1], [0], [0], [1], [0, 0, 1, 1], [], []>} : vector<16x32xf32>, vector<32x64xf32>, vector<16x64xf32> -> vector<16x64xf32>
    %c0_58 = arith.constant 0 : index
    %c0_59 = arith.constant 0 : index
    %c0_60 = arith.constant 0 : index
    %101 = vector.load %arg11[%c0_58, %c0_59, %c0_60] : memref<2x1x64xf32, #tpu.memory_space<vmem>>, vector<1x1x64xf32>
    %102 = vector.shape_cast %101 : vector<1x1x64xf32> to vector<1x64xf32>
    %103 = vector.broadcast %102 : vector<1x64xf32> to vector<16x64xf32>
    %104 = arith.addf %100, %103 : vector<16x64xf32>
    %105 = arith.negf %97 : vector<16x64xf32>
    %106 = math.exp %105 : vector<16x64xf32>
    %cst_61 = arith.constant 1.000000e+00 : f32
    %107 = vector.broadcast %cst_61 : f32 to vector<16x64xf32>
    %108 = arith.addf %107, %106 : vector<16x64xf32>
    %109 = arith.divf %107, %108 : vector<16x64xf32>
    %110 = arith.mulf %97, %109 : vector<16x64xf32>
    %111 = arith.mulf %110, %104 : vector<16x64xf32>
    %c0_62 = arith.constant 0 : index
    %c0_63 = arith.constant 0 : index
    %c0_64 = arith.constant 0 : index
    %112 = vector.load %arg12[%c0_62, %c0_63, %c0_64] : memref<2x64x32xf32, #tpu.memory_space<vmem>>, vector<1x64x32xf32>
    %113 = vector.shape_cast %112 : vector<1x64x32xf32> to vector<64x32xf32>
    %cst_65 = arith.constant dense<0.000000e+00> : vector<16x32xf32>
    %114 = tpu.matmul %111, %113, %cst_65 {dimension_numbers = #tpu.dot_dimension_numbers<[1], [0], [0], [1], [0, 0, 1, 1], [], []>} : vector<16x64xf32>, vector<64x32xf32>, vector<16x32xf32> -> vector<16x32xf32>
    %115 = arith.addf %76, %114 : vector<16x32xf32>
    %c0_66 = arith.constant 0 : index
    %c0_67 = arith.constant 0 : index
    %c0_68 = arith.constant 0 : index
    %116 = vector.load %arg13[%c0_66, %c0_67, %c0_68] : memref<2x1x32xf32, #tpu.memory_space<vmem>>, vector<1x1x32xf32>
    %117 = vector.shape_cast %116 : vector<1x1x32xf32> to vector<1x32xf32>
    %118 = vector.broadcast %117 : vector<1x32xf32> to vector<16x32xf32>
    %119 = arith.addf %115, %118 : vector<16x32xf32>
    %c1 = arith.constant 1 : index
    %c0_69 = arith.constant 0 : index
    %c0_70 = arith.constant 0 : index
    %120 = vector.load %arg2[%c1, %c0_69, %c0_70] : memref<2x1x32xf32, #tpu.memory_space<vmem>>, vector<1x1x32xf32>
    %121 = vector.shape_cast %120 : vector<1x1x32xf32> to vector<1x32xf32>
    %122 = arith.mulf %119, %119 : vector<16x32xf32>
    %cst_71 = arith.constant dense<0.000000e+00> : vector<16xf32>
    %123 = vector.multi_reduction <add>, %122, %cst_71 [1] : vector<16x32xf32> to vector<16xf32>
    %124 = vector.shape_cast %123 : vector<16xf32> to vector<16x1xf32>
    %cst_72 = arith.constant 3.200000e+01 : f32
    %125 = vector.broadcast %cst_72 : f32 to vector<16x1xf32>
    %126 = arith.divf %124, %125 : vector<16x1xf32>
    %cst_73 = arith.constant 9.99999997E-7 : f32
    %127 = vector.broadcast %cst_73 : f32 to vector<16x1xf32>
    %128 = arith.addf %126, %127 : vector<16x1xf32>
    %129 = math.rsqrt %128 : vector<16x1xf32>
    %130 = vector.broadcast %129 : vector<16x1xf32> to vector<16x32xf32>
    %131 = arith.mulf %119, %130 : vector<16x32xf32>
    %132 = vector.broadcast %121 : vector<1x32xf32> to vector<16x32xf32>
    %133 = arith.mulf %131, %132 : vector<16x32xf32>
    %c1_74 = arith.constant 1 : index
    %c0_75 = arith.constant 0 : index
    %c0_76 = arith.constant 0 : index
    %134 = vector.load %arg3[%c1_74, %c0_75, %c0_76] : memref<2x32x160xf32, #tpu.memory_space<vmem>>, vector<1x32x160xf32>
    %135 = vector.shape_cast %134 : vector<1x32x160xf32> to vector<32x160xf32>
    %cst_77 = arith.constant dense<0.000000e+00> : vector<16x160xf32>
    %136 = tpu.matmul %133, %135, %cst_77 {dimension_numbers = #tpu.dot_dimension_numbers<[1], [0], [0], [1], [0, 0, 1, 1], [], []>} : vector<16x32xf32>, vector<32x160xf32>, vector<16x160xf32> -> vector<16x160xf32>
    %c1_78 = arith.constant 1 : index
    %c0_79 = arith.constant 0 : index
    %c0_80 = arith.constant 0 : index
    %137 = vector.load %arg4[%c1_78, %c0_79, %c0_80] : memref<2x1x160xf32, #tpu.memory_space<vmem>>, vector<1x1x160xf32>
    %138 = vector.shape_cast %137 : vector<1x1x160xf32> to vector<1x160xf32>
    %139 = vector.broadcast %138 : vector<1x160xf32> to vector<16x160xf32>
    %140 = arith.addf %136, %139 : vector<16x160xf32>
    %141 = vector.extract_strided_slice %140 {offsets = [0, 0], sizes = [16, 64], strides = [1, 1]} : vector<16x160xf32> to vector<16x64xf32>
    %142 = vector.extract_strided_slice %140 {offsets = [0, 64], sizes = [16, 64], strides = [1, 1]} : vector<16x160xf32> to vector<16x64xf32>
    %143 = vector.extract_strided_slice %140 {offsets = [0, 128], sizes = [16, 32], strides = [1, 1]} : vector<16x160xf32> to vector<16x32xf32>
    %144 = arith.mulf %141, %3 : vector<16x64xf32>
    %145 = arith.mulf %142, %4 : vector<16x64xf32>
    %146 = arith.addf %144, %145 : vector<16x64xf32>
    %147 = vector.extract_strided_slice %146 {offsets = [0, 0], sizes = [16, 16], strides = [1, 1]} : vector<16x64xf32> to vector<16x16xf32>
    %148 = vector.extract_strided_slice %146 {offsets = [0, 32], sizes = [16, 16], strides = [1, 1]} : vector<16x64xf32> to vector<16x16xf32>
    %149 = vector.extract_strided_slice %143 {offsets = [0, 0], sizes = [16, 16], strides = [1, 1]} : vector<16x32xf32> to vector<16x16xf32>
    %cst_81 = arith.constant dense<0.000000e+00> : vector<16x16xf32>
    %150 = tpu.matmul %147, %148, %cst_81 {dimension_numbers = #tpu.dot_dimension_numbers<[1], [1], [0], [0], [0, 0, 1, 0], [], []>} : vector<16x16xf32>, vector<16x16xf32>, vector<16x16xf32> -> vector<16x16xf32>
    %cst_82 = arith.constant dense<0xFF800000> : vector<16xf32>
    %151 = vector.multi_reduction <maximumf>, %150, %cst_82 [1] : vector<16x16xf32> to vector<16xf32>
    %152 = vector.shape_cast %151 : vector<16xf32> to vector<16x1xf32>
    %153 = vector.broadcast %152 : vector<16x1xf32> to vector<16x16xf32>
    %154 = arith.subf %150, %153 : vector<16x16xf32>
    %155 = math.exp %154 : vector<16x16xf32>
    %cst_83 = arith.constant dense<0.000000e+00> : vector<16xf32>
    %156 = vector.multi_reduction <add>, %155, %cst_83 [1] : vector<16x16xf32> to vector<16xf32>
    %157 = vector.shape_cast %156 : vector<16xf32> to vector<16x1xf32>
    %158 = tpu.reciprocal %157 {approx = true} : vector<16x1xf32> -> vector<16x1xf32>
    %159 = vector.broadcast %158 : vector<16x1xf32> to vector<16x16xf32>
    %160 = arith.mulf %155, %159 : vector<16x16xf32>
    %cst_84 = arith.constant dense<0.000000e+00> : vector<16x16xf32>
    %161 = tpu.matmul %160, %149, %cst_84 {dimension_numbers = #tpu.dot_dimension_numbers<[1], [0], [0], [1], [0, 0, 1, 1], [], []>} : vector<16x16xf32>, vector<16x16xf32>, vector<16x16xf32> -> vector<16x16xf32>
    %162 = vector.extract_strided_slice %146 {offsets = [0, 16], sizes = [16, 16], strides = [1, 1]} : vector<16x64xf32> to vector<16x16xf32>
    %163 = vector.extract_strided_slice %146 {offsets = [0, 48], sizes = [16, 16], strides = [1, 1]} : vector<16x64xf32> to vector<16x16xf32>
    %164 = vector.extract_strided_slice %143 {offsets = [0, 16], sizes = [16, 16], strides = [1, 1]} : vector<16x32xf32> to vector<16x16xf32>
    %cst_85 = arith.constant dense<0.000000e+00> : vector<16x16xf32>
    %165 = tpu.matmul %162, %163, %cst_85 {dimension_numbers = #tpu.dot_dimension_numbers<[1], [1], [0], [0], [0, 0, 1, 0], [], []>} : vector<16x16xf32>, vector<16x16xf32>, vector<16x16xf32> -> vector<16x16xf32>
    %cst_86 = arith.constant dense<0xFF800000> : vector<16xf32>
    %166 = vector.multi_reduction <maximumf>, %165, %cst_86 [1] : vector<16x16xf32> to vector<16xf32>
    %167 = vector.shape_cast %166 : vector<16xf32> to vector<16x1xf32>
    %168 = vector.broadcast %167 : vector<16x1xf32> to vector<16x16xf32>
    %169 = arith.subf %165, %168 : vector<16x16xf32>
    %170 = math.exp %169 : vector<16x16xf32>
    %cst_87 = arith.constant dense<0.000000e+00> : vector<16xf32>
    %171 = vector.multi_reduction <add>, %170, %cst_87 [1] : vector<16x16xf32> to vector<16xf32>
    %172 = vector.shape_cast %171 : vector<16xf32> to vector<16x1xf32>
    %173 = tpu.reciprocal %172 {approx = true} : vector<16x1xf32> -> vector<16x1xf32>
    %174 = vector.broadcast %173 : vector<16x1xf32> to vector<16x16xf32>
    %175 = arith.mulf %170, %174 : vector<16x16xf32>
    %cst_88 = arith.constant dense<0.000000e+00> : vector<16x16xf32>
    %176 = tpu.matmul %175, %164, %cst_88 {dimension_numbers = #tpu.dot_dimension_numbers<[1], [0], [0], [1], [0, 0, 1, 1], [], []>} : vector<16x16xf32>, vector<16x16xf32>, vector<16x16xf32> -> vector<16x16xf32>
    %177 = tpu.concatenate %161, %176 in 1 : vector<16x16xf32>, vector<16x16xf32> -> vector<16x32xf32>
    %c1_89 = arith.constant 1 : index
    %c0_90 = arith.constant 0 : index
    %c0_91 = arith.constant 0 : index
    %178 = vector.load %arg5[%c1_89, %c0_90, %c0_91] : memref<2x32x32xf32, #tpu.memory_space<vmem>>, vector<1x32x32xf32>
    %179 = vector.shape_cast %178 : vector<1x32x32xf32> to vector<32x32xf32>
    %cst_92 = arith.constant dense<0.000000e+00> : vector<16x32xf32>
    %180 = tpu.matmul %177, %179, %cst_92 {dimension_numbers = #tpu.dot_dimension_numbers<[1], [0], [0], [1], [0, 0, 1, 1], [], []>} : vector<16x32xf32>, vector<32x32xf32>, vector<16x32xf32> -> vector<16x32xf32>
    %181 = arith.addf %119, %180 : vector<16x32xf32>
    %c1_93 = arith.constant 1 : index
    %c0_94 = arith.constant 0 : index
    %c0_95 = arith.constant 0 : index
    %182 = vector.load %arg6[%c1_93, %c0_94, %c0_95] : memref<2x1x32xf32, #tpu.memory_space<vmem>>, vector<1x1x32xf32>
    %183 = vector.shape_cast %182 : vector<1x1x32xf32> to vector<1x32xf32>
    %184 = vector.broadcast %183 : vector<1x32xf32> to vector<16x32xf32>
    %185 = arith.addf %181, %184 : vector<16x32xf32>
    %c1_96 = arith.constant 1 : index
    %c0_97 = arith.constant 0 : index
    %c0_98 = arith.constant 0 : index
    %186 = vector.load %arg7[%c1_96, %c0_97, %c0_98] : memref<2x1x32xf32, #tpu.memory_space<vmem>>, vector<1x1x32xf32>
    %187 = vector.shape_cast %186 : vector<1x1x32xf32> to vector<1x32xf32>
    %188 = arith.mulf %185, %185 : vector<16x32xf32>
    %cst_99 = arith.constant dense<0.000000e+00> : vector<16xf32>
    %189 = vector.multi_reduction <add>, %188, %cst_99 [1] : vector<16x32xf32> to vector<16xf32>
    %190 = vector.shape_cast %189 : vector<16xf32> to vector<16x1xf32>
    %cst_100 = arith.constant 3.200000e+01 : f32
    %191 = vector.broadcast %cst_100 : f32 to vector<16x1xf32>
    %192 = arith.divf %190, %191 : vector<16x1xf32>
    %cst_101 = arith.constant 9.99999997E-7 : f32
    %193 = vector.broadcast %cst_101 : f32 to vector<16x1xf32>
    %194 = arith.addf %192, %193 : vector<16x1xf32>
    %195 = math.rsqrt %194 : vector<16x1xf32>
    %196 = vector.broadcast %195 : vector<16x1xf32> to vector<16x32xf32>
    %197 = arith.mulf %185, %196 : vector<16x32xf32>
    %198 = vector.broadcast %187 : vector<1x32xf32> to vector<16x32xf32>
    %199 = arith.mulf %197, %198 : vector<16x32xf32>
    %c1_102 = arith.constant 1 : index
    %c0_103 = arith.constant 0 : index
    %c0_104 = arith.constant 0 : index
    %200 = vector.load %arg8[%c1_102, %c0_103, %c0_104] : memref<2x32x64xf32, #tpu.memory_space<vmem>>, vector<1x32x64xf32>
    %201 = vector.shape_cast %200 : vector<1x32x64xf32> to vector<32x64xf32>
    %cst_105 = arith.constant dense<0.000000e+00> : vector<16x64xf32>
    %202 = tpu.matmul %199, %201, %cst_105 {dimension_numbers = #tpu.dot_dimension_numbers<[1], [0], [0], [1], [0, 0, 1, 1], [], []>} : vector<16x32xf32>, vector<32x64xf32>, vector<16x64xf32> -> vector<16x64xf32>
    %c1_106 = arith.constant 1 : index
    %c0_107 = arith.constant 0 : index
    %c0_108 = arith.constant 0 : index
    %203 = vector.load %arg9[%c1_106, %c0_107, %c0_108] : memref<2x1x64xf32, #tpu.memory_space<vmem>>, vector<1x1x64xf32>
    %204 = vector.shape_cast %203 : vector<1x1x64xf32> to vector<1x64xf32>
    %205 = vector.broadcast %204 : vector<1x64xf32> to vector<16x64xf32>
    %206 = arith.addf %202, %205 : vector<16x64xf32>
    %c1_109 = arith.constant 1 : index
    %c0_110 = arith.constant 0 : index
    %c0_111 = arith.constant 0 : index
    %207 = vector.load %arg10[%c1_109, %c0_110, %c0_111] : memref<2x32x64xf32, #tpu.memory_space<vmem>>, vector<1x32x64xf32>
    %208 = vector.shape_cast %207 : vector<1x32x64xf32> to vector<32x64xf32>
    %cst_112 = arith.constant dense<0.000000e+00> : vector<16x64xf32>
    %209 = tpu.matmul %199, %208, %cst_112 {dimension_numbers = #tpu.dot_dimension_numbers<[1], [0], [0], [1], [0, 0, 1, 1], [], []>} : vector<16x32xf32>, vector<32x64xf32>, vector<16x64xf32> -> vector<16x64xf32>
    %c1_113 = arith.constant 1 : index
    %c0_114 = arith.constant 0 : index
    %c0_115 = arith.constant 0 : index
    %210 = vector.load %arg11[%c1_113, %c0_114, %c0_115] : memref<2x1x64xf32, #tpu.memory_space<vmem>>, vector<1x1x64xf32>
    %211 = vector.shape_cast %210 : vector<1x1x64xf32> to vector<1x64xf32>
    %212 = vector.broadcast %211 : vector<1x64xf32> to vector<16x64xf32>
    %213 = arith.addf %209, %212 : vector<16x64xf32>
    %214 = arith.negf %206 : vector<16x64xf32>
    %215 = math.exp %214 : vector<16x64xf32>
    %cst_116 = arith.constant 1.000000e+00 : f32
    %216 = vector.broadcast %cst_116 : f32 to vector<16x64xf32>
    %217 = arith.addf %216, %215 : vector<16x64xf32>
    %218 = arith.divf %216, %217 : vector<16x64xf32>
    %219 = arith.mulf %206, %218 : vector<16x64xf32>
    %220 = arith.mulf %219, %213 : vector<16x64xf32>
    %c1_117 = arith.constant 1 : index
    %c0_118 = arith.constant 0 : index
    %c0_119 = arith.constant 0 : index
    %221 = vector.load %arg12[%c1_117, %c0_118, %c0_119] : memref<2x64x32xf32, #tpu.memory_space<vmem>>, vector<1x64x32xf32>
    %222 = vector.shape_cast %221 : vector<1x64x32xf32> to vector<64x32xf32>
    %cst_120 = arith.constant dense<0.000000e+00> : vector<16x32xf32>
    %223 = tpu.matmul %220, %222, %cst_120 {dimension_numbers = #tpu.dot_dimension_numbers<[1], [0], [0], [1], [0, 0, 1, 1], [], []>} : vector<16x64xf32>, vector<64x32xf32>, vector<16x32xf32> -> vector<16x32xf32>
    %224 = arith.addf %185, %223 : vector<16x32xf32>
    %c1_121 = arith.constant 1 : index
    %c0_122 = arith.constant 0 : index
    %c0_123 = arith.constant 0 : index
    %225 = vector.load %arg13[%c1_121, %c0_122, %c0_123] : memref<2x1x32xf32, #tpu.memory_space<vmem>>, vector<1x1x32xf32>
    %226 = vector.shape_cast %225 : vector<1x1x32xf32> to vector<1x32xf32>
    %227 = vector.broadcast %226 : vector<1x32xf32> to vector<16x32xf32>
    %228 = arith.addf %224, %227 : vector<16x32xf32>
    %c0_124 = arith.constant 0 : index
    %c0_125 = arith.constant 0 : index
    %229 = vector.load %arg17[%c0_124, %c0_125] : memref<1x32xf32, #tpu.memory_space<vmem>>, vector<1x32xf32>
    %230 = arith.mulf %228, %228 : vector<16x32xf32>
    %cst_126 = arith.constant dense<0.000000e+00> : vector<16xf32>
    %231 = vector.multi_reduction <add>, %230, %cst_126 [1] : vector<16x32xf32> to vector<16xf32>
    %232 = vector.shape_cast %231 : vector<16xf32> to vector<16x1xf32>
    %cst_127 = arith.constant 3.200000e+01 : f32
    %233 = vector.broadcast %cst_127 : f32 to vector<16x1xf32>
    %234 = arith.divf %232, %233 : vector<16x1xf32>
    %cst_128 = arith.constant 9.99999997E-7 : f32
    %235 = vector.broadcast %cst_128 : f32 to vector<16x1xf32>
    %236 = arith.addf %234, %235 : vector<16x1xf32>
    %237 = math.rsqrt %236 : vector<16x1xf32>
    %238 = vector.broadcast %237 : vector<16x1xf32> to vector<16x32xf32>
    %239 = arith.mulf %228, %238 : vector<16x32xf32>
    %240 = vector.broadcast %229 : vector<1x32xf32> to vector<16x32xf32>
    %241 = arith.mulf %239, %240 : vector<16x32xf32>
    %242 = tpu.iota {dimensions = array<i32: 1>} : vector<4x16xi32>
    %243 = tpu.iota {dimensions = array<i32: 0>} : vector<4x16xi32>
    %cst_129 = arith.constant 0.000000e+00 : f32
    %244 = vector.broadcast %cst_129 : f32 to vector<4x128xf32>
    %c4_i32 = arith.constant 4 : i32
    %245 = vector.broadcast %c4_i32 : i32 to vector<4x16xi32>
    %246 = arith.muli %243, %245 : vector<4x16xi32>
    %c0_i32 = arith.constant 0 : i32
    %247 = vector.broadcast %c0_i32 : i32 to vector<4x16xi32>
    %248 = arith.addi %246, %247 : vector<4x16xi32>
    %249 = arith.cmpi eq, %242, %248 : vector<4x16xi32>
    %250 = arith.extui %249 : vector<4x16xi1> to vector<4x16xi32>
    %251 = arith.sitofp %250 : vector<4x16xi32> to vector<4x16xf32>
    %cst_130 = arith.constant dense<0.000000e+00> : vector<4x32xf32>
    %252 = tpu.matmul %251, %241, %cst_130 {dimension_numbers = #tpu.dot_dimension_numbers<[1], [0], [0], [1], [0, 0, 1, 1], [], []>} : vector<4x16xf32>, vector<16x32xf32>, vector<4x32xf32> -> vector<4x32xf32>
    %c0_131 = arith.constant 0 : index
    %c0_132 = arith.constant 0 : index
    %c0_133 = arith.constant 0 : index
    %253 = vector.load %arg18[%c0_131, %c0_132, %c0_133] : memref<4x32x128xf32, #tpu.memory_space<vmem>>, vector<1x32x128xf32>
    %254 = vector.shape_cast %253 : vector<1x32x128xf32> to vector<32x128xf32>
    %cst_134 = arith.constant dense<0.000000e+00> : vector<4x128xf32>
    %255 = tpu.matmul %252, %254, %cst_134 {dimension_numbers = #tpu.dot_dimension_numbers<[1], [0], [0], [1], [0, 0, 1, 1], [], []>} : vector<4x32xf32>, vector<32x128xf32>, vector<4x128xf32> -> vector<4x128xf32>
    %256 = arith.addf %244, %255 : vector<4x128xf32>
    %c4_i32_135 = arith.constant 4 : i32
    %257 = vector.broadcast %c4_i32_135 : i32 to vector<4x16xi32>
    %258 = arith.muli %243, %257 : vector<4x16xi32>
    %c1_i32 = arith.constant 1 : i32
    %259 = vector.broadcast %c1_i32 : i32 to vector<4x16xi32>
    %260 = arith.addi %258, %259 : vector<4x16xi32>
    %261 = arith.cmpi eq, %242, %260 : vector<4x16xi32>
    %262 = arith.extui %261 : vector<4x16xi1> to vector<4x16xi32>
    %263 = arith.sitofp %262 : vector<4x16xi32> to vector<4x16xf32>
    %cst_136 = arith.constant dense<0.000000e+00> : vector<4x32xf32>
    %264 = tpu.matmul %263, %241, %cst_136 {dimension_numbers = #tpu.dot_dimension_numbers<[1], [0], [0], [1], [0, 0, 1, 1], [], []>} : vector<4x16xf32>, vector<16x32xf32>, vector<4x32xf32> -> vector<4x32xf32>
    %c1_137 = arith.constant 1 : index
    %c0_138 = arith.constant 0 : index
    %c0_139 = arith.constant 0 : index
    %265 = vector.load %arg18[%c1_137, %c0_138, %c0_139] : memref<4x32x128xf32, #tpu.memory_space<vmem>>, vector<1x32x128xf32>
    %266 = vector.shape_cast %265 : vector<1x32x128xf32> to vector<32x128xf32>
    %cst_140 = arith.constant dense<0.000000e+00> : vector<4x128xf32>
    %267 = tpu.matmul %264, %266, %cst_140 {dimension_numbers = #tpu.dot_dimension_numbers<[1], [0], [0], [1], [0, 0, 1, 1], [], []>} : vector<4x32xf32>, vector<32x128xf32>, vector<4x128xf32> -> vector<4x128xf32>
    %268 = arith.addf %256, %267 : vector<4x128xf32>
    %c4_i32_141 = arith.constant 4 : i32
    %269 = vector.broadcast %c4_i32_141 : i32 to vector<4x16xi32>
    %270 = arith.muli %243, %269 : vector<4x16xi32>
    %c2_i32 = arith.constant 2 : i32
    %271 = vector.broadcast %c2_i32 : i32 to vector<4x16xi32>
    %272 = arith.addi %270, %271 : vector<4x16xi32>
    %273 = arith.cmpi eq, %242, %272 : vector<4x16xi32>
    %274 = arith.extui %273 : vector<4x16xi1> to vector<4x16xi32>
    %275 = arith.sitofp %274 : vector<4x16xi32> to vector<4x16xf32>
    %cst_142 = arith.constant dense<0.000000e+00> : vector<4x32xf32>
    %276 = tpu.matmul %275, %241, %cst_142 {dimension_numbers = #tpu.dot_dimension_numbers<[1], [0], [0], [1], [0, 0, 1, 1], [], []>} : vector<4x16xf32>, vector<16x32xf32>, vector<4x32xf32> -> vector<4x32xf32>
    %c2 = arith.constant 2 : index
    %c0_143 = arith.constant 0 : index
    %c0_144 = arith.constant 0 : index
    %277 = vector.load %arg18[%c2, %c0_143, %c0_144] : memref<4x32x128xf32, #tpu.memory_space<vmem>>, vector<1x32x128xf32>
    %278 = vector.shape_cast %277 : vector<1x32x128xf32> to vector<32x128xf32>
    %cst_145 = arith.constant dense<0.000000e+00> : vector<4x128xf32>
    %279 = tpu.matmul %276, %278, %cst_145 {dimension_numbers = #tpu.dot_dimension_numbers<[1], [0], [0], [1], [0, 0, 1, 1], [], []>} : vector<4x32xf32>, vector<32x128xf32>, vector<4x128xf32> -> vector<4x128xf32>
    %280 = arith.addf %268, %279 : vector<4x128xf32>
    %c4_i32_146 = arith.constant 4 : i32
    %281 = vector.broadcast %c4_i32_146 : i32 to vector<4x16xi32>
    %282 = arith.muli %243, %281 : vector<4x16xi32>
    %c3_i32 = arith.constant 3 : i32
    %283 = vector.broadcast %c3_i32 : i32 to vector<4x16xi32>
    %284 = arith.addi %282, %283 : vector<4x16xi32>
    %285 = arith.cmpi eq, %242, %284 : vector<4x16xi32>
    %286 = arith.extui %285 : vector<4x16xi1> to vector<4x16xi32>
    %287 = arith.sitofp %286 : vector<4x16xi32> to vector<4x16xf32>
    %cst_147 = arith.constant dense<0.000000e+00> : vector<4x32xf32>
    %288 = tpu.matmul %287, %241, %cst_147 {dimension_numbers = #tpu.dot_dimension_numbers<[1], [0], [0], [1], [0, 0, 1, 1], [], []>} : vector<4x16xf32>, vector<16x32xf32>, vector<4x32xf32> -> vector<4x32xf32>
    %c3 = arith.constant 3 : index
    %c0_148 = arith.constant 0 : index
    %c0_149 = arith.constant 0 : index
    %289 = vector.load %arg18[%c3, %c0_148, %c0_149] : memref<4x32x128xf32, #tpu.memory_space<vmem>>, vector<1x32x128xf32>
    %290 = vector.shape_cast %289 : vector<1x32x128xf32> to vector<32x128xf32>
    %cst_150 = arith.constant dense<0.000000e+00> : vector<4x128xf32>
    %291 = tpu.matmul %288, %290, %cst_150 {dimension_numbers = #tpu.dot_dimension_numbers<[1], [0], [0], [1], [0, 0, 1, 1], [], []>} : vector<4x32xf32>, vector<32x128xf32>, vector<4x128xf32> -> vector<4x128xf32>
    %292 = arith.addf %280, %291 : vector<4x128xf32>
    %c0_151 = arith.constant 0 : index
    %c0_152 = arith.constant 0 : index
    %293 = vector.load %arg19[%c0_151, %c0_152] : memref<1x128xf32, #tpu.memory_space<vmem>>, vector<1x128xf32>
    %294 = vector.broadcast %293 : vector<1x128xf32> to vector<4x128xf32>
    %295 = arith.addf %292, %294 : vector<4x128xf32>
    %cst_153 = arith.constant 0.707106769 : f32
    %296 = vector.broadcast %cst_153 : f32 to vector<4x128xf32>
    %297 = arith.mulf %295, %296 : vector<4x128xf32>
    %298 = math.absf %297 : vector<4x128xf32>
    %cst_154 = arith.constant 0.327591091 : f32
    %299 = vector.broadcast %cst_154 : f32 to vector<4x128xf32>
    %300 = arith.mulf %299, %298 : vector<4x128xf32>
    %cst_155 = arith.constant 1.000000e+00 : f32
    %301 = vector.broadcast %cst_155 : f32 to vector<4x128xf32>
    %302 = arith.addf %301, %300 : vector<4x128xf32>
    %cst_156 = arith.constant 1.000000e+00 : f32
    %303 = vector.broadcast %cst_156 : f32 to vector<4x128xf32>
    %304 = arith.divf %303, %302 : vector<4x128xf32>
    %cst_157 = arith.constant 1.06140542 : f32
    %305 = vector.broadcast %cst_157 : f32 to vector<4x128xf32>
    %306 = arith.mulf %304, %305 : vector<4x128xf32>
    %cst_158 = arith.constant -1.45315206 : f32
    %307 = vector.broadcast %cst_158 : f32 to vector<4x128xf32>
    %308 = arith.addf %307, %306 : vector<4x128xf32>
    %309 = arith.mulf %304, %308 : vector<4x128xf32>
    %cst_159 = arith.constant 1.42141378 : f32
    %310 = vector.broadcast %cst_159 : f32 to vector<4x128xf32>
    %311 = arith.addf %310, %309 : vector<4x128xf32>
    %312 = arith.mulf %304, %311 : vector<4x128xf32>
    %cst_160 = arith.constant -0.284496725 : f32
    %313 = vector.broadcast %cst_160 : f32 to vector<4x128xf32>
    %314 = arith.addf %313, %312 : vector<4x128xf32>
    %315 = arith.mulf %304, %314 : vector<4x128xf32>
    %cst_161 = arith.constant 0.254829586 : f32
    %316 = vector.broadcast %cst_161 : f32 to vector<4x128xf32>
    %317 = arith.addf %316, %315 : vector<4x128xf32>
    %318 = arith.mulf %304, %317 : vector<4x128xf32>
    %cst_162 = arith.constant 0.000000e+00 : f32
    %319 = vector.broadcast %cst_162 : f32 to vector<4x128xf32>
    %320 = arith.subf %319, %298 : vector<4x128xf32>
    %321 = arith.mulf %320, %298 : vector<4x128xf32>
    %322 = math.exp %321 : vector<4x128xf32>
    %323 = arith.mulf %318, %322 : vector<4x128xf32>
    %cst_163 = arith.constant 1.000000e+00 : f32
    %324 = vector.broadcast %cst_163 : f32 to vector<4x128xf32>
    %325 = arith.subf %324, %323 : vector<4x128xf32>
    %cst_164 = arith.constant 0.000000e+00 : f32
    %326 = vector.broadcast %cst_164 : f32 to vector<4x128xf32>
    %327 = arith.cmpf oge, %297, %326 : vector<4x128xf32>
    %cst_165 = arith.constant 0.000000e+00 : f32
    %328 = vector.broadcast %cst_165 : f32 to vector<4x128xf32>
    %329 = arith.subf %328, %325 : vector<4x128xf32>
    %330 = arith.select %327, %325, %329 : vector<4x128xi1>, vector<4x128xf32>
    %cst_166 = arith.constant 5.000000e-01 : f32
    %331 = vector.broadcast %cst_166 : f32 to vector<4x128xf32>
    %332 = arith.mulf %331, %295 : vector<4x128xf32>
    %cst_167 = arith.constant 1.000000e+00 : f32
    %333 = vector.broadcast %cst_167 : f32 to vector<4x128xf32>
    %334 = arith.addf %333, %330 : vector<4x128xf32>
    %335 = arith.mulf %332, %334 : vector<4x128xf32>
    %c0_168 = arith.constant 0 : index
    %c0_169 = arith.constant 0 : index
    %336 = vector.load %arg20[%c0_168, %c0_169] : memref<128x128xf32, #tpu.memory_space<vmem>>, vector<128x128xf32>
    %cst_170 = arith.constant dense<0.000000e+00> : vector<4x128xf32>
    %337 = tpu.matmul %335, %336, %cst_170 {dimension_numbers = #tpu.dot_dimension_numbers<[1], [0], [0], [1], [0, 0, 1, 1], [], []>} : vector<4x128xf32>, vector<128x128xf32>, vector<4x128xf32> -> vector<4x128xf32>
    %c0_171 = arith.constant 0 : index
    %c0_172 = arith.constant 0 : index
    %338 = vector.load %arg21[%c0_171, %c0_172] : memref<1x128xf32, #tpu.memory_space<vmem>>, vector<1x128xf32>
    %339 = vector.broadcast %338 : vector<1x128xf32> to vector<4x128xf32>
    %340 = arith.addf %337, %339 : vector<4x128xf32>
    %c0_173 = arith.constant 0 : index
    %c0_174 = arith.constant 0 : index
    %341 = vector.load %arg22[%c0_173, %c0_174] : memref<4x128xf32, #tpu.memory_space<vmem>>, vector<4x128xf32>
    tpu.vector_store %arg22[%c0_173, %c0_174], %340 {strides = array<i32>} : memref<4x128xf32, #tpu.memory_space<vmem>>, vector<4x128xf32>,
    return
  }
}

</mosaic_0001>

<bundles_post_ra>
// kernel: forward.1
= control target key start
LH: loop header
LB: loop body
LE: loop exit
PB: predicated region body
PF: predicated region fallthrough
CT: control target
= control target key end

     0   :  { %vm85_vm0 = vcmask 785408   ;;  %vm174_vm1 = vcmask 261120   ;;  %v3550_v23 = vmov 0.0   ;;  %v208_v44 = vlaneseq  ;;  %s4366_s27 = smov 16   ;;  %s4385_s24 = smov 16   ;;  %s4336_s1 = inlined_call_operand.vmem [shape: f32[96,32], index: 1, kind: input, shape index: {}]   ;;  %s4337_s0 = inlined_call_operand.vmem [shape: f32[16,96], index: 0, kind: input, shape index: {}]   ;;  %s4338_s3 = inlined_call_operand.vmem [shape: f32[2,32,160], index: 3, kind: input, shape index: {}]   ;;  %s4339_s15 = inlined_call_operand.vmem [shape: f32[16,64], index: 15, kind: input, shape index: {}]   ;;  %s4340_s2 = inlined_call_operand.vmem [shape: f32[2,1,32], index: 2, kind: input, shape index: {}]   ;;  %s4341_s4 = inlined_call_operand.vmem [shape: f32[2,1,160], index: 4, kind: input, shape index: {}]   ;;  %s4342_s14 = inlined_call_operand.vmem [shape: f32[16,64], index: 14, kind: input, shape index: {}]   ;;  %s4343_s16 = inlined_call_operand.vmem [shape: f32[2,16,16], index: 16, kind: input, shape index: {}]   ;;  %s4344_s5 = inlined_call_operand.vmem [shape: f32[2,32,32], index: 5, kind: input, shape index: {}]   ;;  %s4345_s6 = inlined_call_operand.vmem [shape: f32[2,1,32], index: 6, kind: input, shape index: {}]   ;;  %s4346_s8 = inlined_call_operand.vmem [shape: f32[2,32,64], index: 8, kind: input, shape index: {}]   ;;  %s4347_s10 = inlined_call_operand.vmem [shape: f32[2,32,64], index: 10, kind: input, shape index: {}]   ;;  %s4348_s7 = inlined_call_operand.vmem [shape: f32[2,1,32], index: 7, kind: input, shape index: {}]   ;;  %s4349_s12 = inlined_call_operand.vmem [shape: f32[2,64,32], index: 12, kind: input, shape index: {}]   ;;  %s4350_s9 = inlined_call_operand.vmem [shape: f32[2,1,64], index: 9, kind: input, shape index: {}]   ;;  %s4351_s11 = inlined_call_operand.vmem [shape: f32[2,1,64], index: 11, kind: input, shape index: {}]   ;;  %s4352_s13 = inlined_call_operand.vmem [shape: f32[2,1,32], index: 13, kind: input, shape index: {}]   ;;  %s4353_s18 = inlined_call_operand.vmem [shape: f32[4,32,128], index: 18, kind: input, shape index: {}]   ;;  %s4354_s17 = inlined_call_operand.vmem [shape: f32[1,32], index: 17, kind: input, shape index: {}]   ;;  %s4355_s20 = inlined_call_operand.vmem [shape: f32[128,128], index: 20, kind: input, shape index: {}]   ;;  %s4356_s19 = inlined_call_operand.vmem [shape: f32[1,128], index: 19, kind: input, shape index: {}]   ;;  %s4357_s21 = inlined_call_operand.vmem [shape: f32[1,128], index: 21, kind: input, shape index: {}]   ;;  %s4358_s22 = inlined_call_operand.vmem [shape: f32[4,128], index: 22, kind: output, shape index: {}]  }
   0x1   :  { %4370 = sst [smem:[#allocation2_spill]] %s4336_s1  ;;  %vm331_vm2 = vcmask 130048   ;;  %vm1053_vm3 = vcmask 523264   ;;  %vm3556_vm4 = vmmov 0  }
   0x2   :  { %4371 = sst [smem:[#allocation3_spill]] %s4337_s0  ;;  %s3551_s0 = smov 64   ;;  %v3768_v45 = vshrl.u32 %v208_v44, 7 }
   0x3   :  { %4372 = sst [smem:[#allocation4_spill]] %s4338_s3 }
   0x4   :  { %4373 = sst [smem:[#allocation5_spill]] %s4339_s15  ;;  %v210_v46 = vsub.s32 0, %v3768_v45  ;;  %s3553_s15 = smov 80  }
   0x5   :  { %4374 = sst [smem:[#allocation6_spill]] %s4340_s2 }
   0x6   :  { %4375 = sst [smem:[#allocation7_spill]] %s4341_s4  ;;  %s3552_s4 = smov 96  }
   0x7   :  { %4376 = sst [smem:[#allocation8_spill]] %s4342_s14 }
   0x8   :  { %s4377_s29 = sld [smem:[#allocation2_spill]] }
   0x9   :  { %s4378_s25 = sld [smem:[#allocation3_spill]] }
   0xa   :  { %s4379_s30 = sld [smem:[#allocation4_spill]] }
   0xb   :  { %s4380_s23 = sld [smem:[#allocation5_spill]] }
   0xc   :  { %s4381_s3 = sld [smem:[#allocation6_spill]] }
   0xd   :  { %s4382_s28 = sld [smem:[#allocation7_spill]] }
   0xe   :  { %v84_v0 = vld [vmem:[%s4377_s29 + $0x58] sm:$0xff]  ;;  %v83_v1 = vld [vmem:[%s4377_s29 + $0x50] sm:$0xff]  ;;  %v82_v2 = vld [vmem:[%s4377_s29 + $0x48] sm:$0xff]  ;;  %s4383_s2 = sld [smem:[#allocation8_spill]] }
   0xf   :  { %3177 = vmatprep.subr.mxu0 %v84_v0  ;;  %v81_v3 = vld [vmem:[%s4377_s29 + $0x40] sm:$0xff]  ;;  %v80_v5 = vld [vmem:[%s4377_s29 + $0x38] sm:$0xff]  ;;  %v79_v6 = vld [vmem:[%s4377_s29 + $0x30] sm:$0xff] }
  0x10   :  { %3178 = vmatpush3.msra.mxu0 %v84_v0  ;;  %v71_v4 = vld [vmem:[%s4378_s25] sm:$0xff]  ;;  %v78_v7 = vld [vmem:[%s4377_s29 + $0x28] sm:$0xff]  ;;  %v76_v9 = vld [vmem:[%s4377_s29 + $0x18] sm:$0xff] }
  0x11   :  { %3179 = vmatprep.subr.mxu0 %v83_v1  ;;  %3201 = vmatprep.mubr.msk.f32.mxu0 %vm85_vm0, %v71_v4  ;;  %v77_v8 = vld [vmem:[%s4377_s29 + $0x20] sm:$0xff]  ;;  %v75_v10 = vld [vmem:[%s4377_s29 + $0x10] sm:$0xff]  ;;  %v74_v11 = vld [vmem:[%s4377_s29 + $0x8] sm:$0xff] }
  0x12   :  { %3180 = vmatpush3.msra.mxu0 %v83_v1  ;;  %v73_v12 = vld [vmem:[%s4377_s29] sm:$0xff]  ;;  %v72_v13 = vld [vmem:[%s4378_s25 + $0x8] sm:$0xff]  ;;  %v205_v20 = vld [vmem:[%s4379_s30 + $0x38] sm:$0xff]  ;;  %s4368_s29 = smov 112  }
  0x13   :  { %3181 = vmatprep.subr.mxu0 %v82_v2  ;;  %v204_v21 = vld [vmem:[%s4379_s30 + $0x30] sm:$0xff]  ;;  %v203_v22 = vld [vmem:[%s4379_s30 + $0x28] sm:$0xff]  ;;  %v202_v24 = vld [vmem:[%s4379_s30 + $0x20] sm:$0xff] }
  0x14   :  { %3182 = vmatpush3.msra.mxu0 %v82_v2  ;;  %v201_v25 = vld [vmem:[%s4379_s30 + $0x18] sm:$0xff]  ;;  %v200_v26 = vld [vmem:[%s4379_s30 + $0x10] sm:$0xff]  ;;  %v199_v27 = vld [vmem:[%s4379_s30 + $0x8] sm:$0xff]  ;;  %v214_v2 = vsub.s32 1, %v3768_v45 }
  0x15   :  { %3183 = vmatprep.subr.mxu0 %v81_v3  ;;  %v198_v28 = vld [vmem:[%s4379_s30] sm:$0xff]  ;;  %v170_v29 = vld [vmem:[%s4380_s23 + $0x8] sm:$0xff] }
  0x16   :  { %3184 = vmatpush3.msra.mxu0 %v81_v3  ;;  %307 = vrot.lane.b32.xlu1 %v170_v29, %s3551_s0  ;;  %v169_v30 = vld [vmem:[%s4380_s23] sm:$0xff]  ;;  %v3793_v61 = vld [vmem:[%s4383_s2 + $0x8] sm:$0xff] }
  0x17   :  { %3185 = vmatprep.subr.mxu0 %v80_v5  ;;  %v2904_v38 = vld [vmem:[%s4381_s3] ss:$0 sm:$0xff] }
  0x18   :  { %3186 = vmatpush3.msra.mxu0 %v80_v5  ;;  %v206_v48 = vld [vmem:[%s4382_s28] sm:$0x3] }
  0x19   :  { %3187 = vmatprep.subr.mxu0 %v79_v6  ;;  %v211_v49 = vrot.slane %v206_v48, %v210_v46  ;;  %v3787_v58 = vld [vmem:[%s4383_s2] sm:$0xff]  ;;  %v215_v5 = vrot.slane %v206_v48, %v214_v2 }
  0x1a   :  { %3188 = vmatpush3.msra.mxu0 %v79_v6  ;;  %305 = vrot.lane.b32.xlu1 %v169_v30, %s3551_s0 }
  0x1b   :  { %3189 = vmatprep.subr.mxu0 %v78_v7 }
  0x1c   :  { %3190 = vmatpush3.msra.mxu0 %v78_v7 }
  0x1d   :  { %3191 = vmatprep.subr.mxu0 %v77_v8 }
  0x1e   :  { %3192 = vmatpush3.msra.mxu0 %v77_v8 }
  0x1f   :  { %3193 = vmatprep.subr.mxu0 %v76_v9 }
  0x20   :  { %3194 = vmatpush3.msra.mxu0 %v76_v9  ;;  %v324_v9 = vld [vmem:[%s4343_s16 + $0x8] sm:$0xff] }
  0x21   :  { %3195 = vmatprep.subr.mxu0 %v75_v10 }
  0x22   :  { %3196 = vmatpush3.msra.mxu0 %v75_v10 }
  0x23   :  { %3197 = vmatprep.subr.mxu0 %v74_v11 }
  0x24   :  { %3198 = vmatpush3.msra.mxu0 %v74_v11  ;;  %v323_v11 = vld [vmem:[%s4343_s16] sm:$0xff] }
  0x25   :  { %3199 = vmatprep.subr.mxu0 %v73_v12 }
  0x26   :  { %3200 = vmatpush3.msra.mxu0 %v73_v12 }
  0x27   :  { %3202 = vmatmul.mubr.msk.f32.vlgmr.msra.gmra.mxu0 %vm85_vm0, %v72_v13  ;;  %248 = vmatprep.subr.mxu0 %v205_v20 }
  0x28   :  { %288 = vmatprep.mubr.f32.mxu0 %v3550_v23  ;;  %249 = vmatpush1.msra.mxu0 %v204_v21 }
  0x29   :  { %250 = vmatprep.subr.mxu0 %v203_v22 }
  0x2a   :  { %251 = vmatpush1.msra.mxu0 %v202_v24 }
  0x2b   :  { %252 = vmatprep.subr.mxu0 %v201_v25 }
  0x2c   :  { %253 = vmatpush1.msra.mxu0 %v200_v26 }
  0x2d   :  { %254 = vmatprep.subr.mxu0 %v199_v27 }
  0x2e   :  { %255 = vmatpush1.msra.mxu0 %v198_v28 }
  0x88   :  { %v3771_v47 = vpop.permute.xlu1 %307 }
  0x8c   :  { %v3778_v51 = vpop.permute.xlu1 %305 }
  0xe7   :  { %v3716_v14 = vpop.f32.mrf.mxu0 }
  0xe8   :  { %v173_v18 = vmul.f32 %v3716_v14, %v3716_v14 }
  0xe9   :  { %v3718_v15 = vpop.f32.mrf.mxu0 }
  0xea   :  { %v172_v16 = vmul.f32 %v3718_v15, %v3718_v15  ;;  %v178_v19 = vsel %vm174_vm1, %v173_v18, 0.0 }
  0xec   :  { %v175_v17 = vsel %vm174_vm1, %v172_v16, 0.0 }
  0xed   :  { %176 = vadd.xlane.f32.xlu0 %v175_v17 }
  0xf1   :  { %179 = vadd.xlane.f32.xlu0 %v178_v19 }
 0x176   :  { %v177_v31 = vpop.xlane.xlu0 %176 }
 0x177   :  { %v182_v32 = vmul.f32 0.03125, %v177_v31 }
 0x179   :  { %v184_v33 = vadd.f32 1e-06, %v182_v32 }
 0x17a   :  { %v180_v34 = vpop.xlane.xlu0 %179 }
 0x17b   :  { %3478 = vrsqrt.f32 %v184_v33  ;;  %v183_v35 = vmul.f32 0.03125, %v180_v34 }
 0x17d   :  { %v185_v36 = vadd.f32 1e-06, %v183_v35 }
 0x17f   :  { %3480 = vrsqrt.f32 %v185_v36 }
 0x188   :  { %v3479_v37 = vpop.eup %3478 }
 0x189   :  { %v188_v39 = vmul.f32 %v3479_v37, %v3718_v15 }
 0x18b   :  { %v196_v40 = vmul.f32 %v2904_v38, %v188_v39 }
 0x18c   :  { %v3481_v41 = vpop.eup %3480 }
 0x18d   :  { %2905 = vmatmul.mubr.msk.f32.vlgmr.msra.gmra.mxu0 %vm174_vm1, %v196_v40  ;;  %v189_v42 = vmul.f32 %v3481_v41, %v3716_v14 }
 0x18e   :  { %294 = vmatprep.mubr.f32.mxu0 %v3550_v23 }
 0x18f   :  { %v197_v43 = vmul.f32 %v2904_v38, %v189_v42 }
 0x191   :  { %2906 = vmatmul.mubr.msk.f32.gmra.mxu0 %vm174_vm1, %v197_v43 }
 0x24d   :  { %v290_v50 = vpop.f32.mrf.mxu0 }
 0x24e   :  { %v291_v52 = vadd.f32 %v290_v50, %v211_v49 }
 0x24f   :  { %v292_v53 = vpop.f32.mrf.mxu0 }
 0x250   :  { %v311_v54 = vmul.f32 %v3778_v51, %v291_v52  ;;  %v301_v59 = vmul.f32 %v291_v52, %v3787_v58  ;;  %v3809_v8 = vadd.f32 %v292_v53, %v215_v5 }
 0x251   :  { %v296_v55 = vpop.f32.mrf.mxu0 }
 0x252   :  { %v297_v56 = vadd.f32 %v296_v55, %v211_v49  ;;  %315 = vrot.lane.b32.xlu1 %v311_v54, %s3551_s0 }
 0x253   :  { %v298_v4 = vpop.f32.mrf.mxu0 }
 0x254   :  { %v312_v57 = vmul.f32 %v3771_v47, %v297_v56  ;;  %v302_v63 = vmul.f32 %v297_v56, %v3793_v61  ;;  %v3804_v7 = vadd.f32 %v298_v4, %v215_v5 }
 0x256   :  { %317 = vrot.lane.b32.xlu0 %v312_v57, %s3551_s0 }
 0x2c4   :  { %v316_v60 = vpop.permute.xlu1 %315 }
 0x2c5   :  { %v321_v62 = vadd.f32 %v316_v60, %v301_v59 }
 0x2c7   :  { %3208 = vmatprep.mubr.msk.f32.mxu1 %vm331_vm2, %v321_v62 }
 0x2c8   :  { %v318_v0 = vpop.permute.xlu0 %317 }
 0x2c9   :  { %v322_v1 = vadd.f32 %v318_v0, %v302_v63 }
 0x2cb   :  { %329 = vrot.lane.b32.xlu1 %v322_v1, %s3552_s4 }
 0x2cf   :  { %327 = vrot.lane.b32.xlu1 %v321_v62, %s3552_s4 }
 0x33d   :  { %v330_v3 = vpop.permute.xlu1 %329 }
 0x33e   :  { %3204 = vmatprep.subr.msk.mxu1 %vm331_vm2, %v330_v3 }
 0x33f   :  { %3205 = vmatpush3.xpose.msk.msra.mxu1 %vm331_vm2, %v330_v3 }
 0x341   :  { %v328_v6 = vpop.permute.xlu1 %327 }
 0x342   :  { %3206 = vmatprep.subr.msk.mxu1 %vm331_vm2, %v328_v6 }
 0x343   :  { %3207 = vmatpush3.xpose.msk.msra.mxu1 %vm331_vm2, %v328_v6 }
 0x344   :  { %3211 = vmatprep.subr.mxu1 %v3804_v7 }
 0x346   :  { %3209 = vmatmul.mubr.msk.f32.vlgmr.msra.gmra.mxu1 %vm331_vm2, %v322_v1 }
 0x347   :  { %3212 = vmatpush3.msra.mxu1 %v3804_v7 }
 0x348   :  { %3213 = vmatprep.subr.mxu1 %v3809_v8 }
 0x349   :  { %3214 = vmatpush3.msra.mxu1 %v3809_v8 }
 0x406   :  { %v3210_v10 = vpop.f32.mrf.mxu1 }
 0x407   :  { %v412_v12 = vadd.f32 %v3210_v10, %v324_v9 }
 0x408   :  { %v406_v13 = vpop.f32.mrf.mxu1 }
 0x409   :  { %v407_v16 = vadd.f32 %v406_v13, %v323_v11  ;;  %v418_v17 = vsel %vm331_vm2, %v412_v12, -inf  ;;  %v730_v13 = vld [vmem:[%s4344_s5] sm:$0xff] }
 0x40a   :  { %419 = vmax.xlane.f32.xlu0 %v418_v17 }
 0x40b   :  { %v415_v18 = vsel %vm331_vm2, %v407_v16, -inf }
 0x40c   :  { %416 = vmax.xlane.f32.xlu1 %v415_v18 }
 0x41d   :  { %522 = vrot.lane.b32.xlu1 %v321_v62, %s3553_s15 }
 0x420   :  { %524 = vrot.lane.b32.xlu0 %v322_v1, %s3553_s15 }
 0x424   :  { %520 = vrot.lane.b32.xlu0 %v322_v1, %s4368_s29 }
 0x493   :  { %v420_v19 = vpop.xlane.xlu0 %419 }
 0x494   :  { %v422_v20 = vsub.f32 %v412_v12, %v420_v19  ;;  %v731_v12 = vld [vmem:[%s4344_s5 + $0x8] sm:$0xff] }
 0x495   :  { %v417_v21 = vpop.xlane.xlu1 %416 }
 0x496   :  { %v425_v22 = vmul.f32 1.442695, %v422_v20  ;;  %v421_v24 = vsub.f32 %v407_v16, %v417_v21 }
 0x497   :  { %v525_v25 = vpop.permute.xlu0 %524 }
 0x498   :  { %3482 = vpow2.f32 %v425_v22  ;;  %v423_v26 = vmul.f32 1.442695, %v421_v24  ;;  %3218 = vmatprep.subr.msk.mxu1 %vm331_vm2, %v525_v25  ;;  %v2921_v24 = vld [vmem:[%s4345_s6] ss:$0 sm:$0xff] }
 0x499   :  { %v523_v31 = vpop.permute.xlu1 %522 }
 0x49a   :  { %3484 = vpow2.f32 %v423_v26 }
 0x49b   :  { %v521_v39 = vpop.permute.xlu0 %520 }
 0x4a5   :  { %v3483_v27 = vpop.eup %3482 }
 0x4a6   :  { %v430_v28 = vsel %vm331_vm2, %v3483_v27, 0.0 }
 0x4a7   :  { %v3485_v29 = vpop.eup %3484  ;;  %431 = vadd.xlane.f32.xlu1 %v430_v28 }
 0x4a8   :  { %v427_v30 = vsel %vm331_vm2, %v3485_v29, 0.0 }
 0x4ab   :  { %428 = vadd.xlane.f32.xlu1 %v427_v30 }
 0x4bc   :  { %518 = vrot.lane.b32.xlu1 %v321_v62, %s4368_s29 }
 0x530   :  { %v432_v32 = vpop.xlane.xlu1 %431 }
 0x531   :  { %3486 = vrcp.f32 %v432_v32 }
 0x534   :  { %v429_v33 = vpop.xlane.xlu1 %428 }
 0x535   :  { %3488 = vrcp.f32 %v429_v33 }
 0x538   :  { %v519_v38 = vpop.permute.xlu1 %518 }
 0x53e   :  { %v3487_v34 = vpop.eup %3486 }
 0x53f   :  { %v436_v37 = vmul.f32 %v3487_v34, %v3483_v27  ;;  %v853_v34 = vld [vmem:[%s4346_s8 + $0x10] sm:$0xff] }
 0x542   :  { %v3489_v35 = vpop.eup %3488 }
 0x543   :  { %v435_v36 = vmul.f32 %v3489_v35, %v3485_v29  ;;  %v945_v35 = vld [vmem:[%s4347_s10 + $0x10] sm:$0xff] }
 0x545   :  { %3215 = vmatprep.mubr.msk.f32.mxu1 %vm331_vm2, %v435_v36  ;;  %v852_v36 = vld [vmem:[%s4346_s8 + $0x8] sm:$0xff] }
 0x546   :  { %3216 = vmatmul.mubr.msk.f32.vlgmr.msra.gmra.mxu1 %vm331_vm2, %v436_v37  ;;  %v944_v37 = vld [vmem:[%s4347_s10 + $0x8] sm:$0xff] }
 0x547   :  { %3219 = vmatpush3.xpose.msk.msra.mxu1 %vm331_vm2, %v525_v25  ;;  %3222 = vmatprep.mubr.msk.f32.mxu1 %vm331_vm2, %v519_v38  ;;  %v851_v38 = vld [vmem:[%s4346_s8] sm:$0xff] }
 0x548   :  { %3220 = vmatprep.subr.msk.mxu1 %vm331_vm2, %v523_v31 }
 0x54b   :  { %3221 = vmatpush3.xpose.msk.msra.mxu1 %vm331_vm2, %v523_v31 }
 0x54e   :  { %3223 = vmatmul.mubr.msk.f32.vlgmr.msra.gmra.mxu1 %vm331_vm2, %v521_v39  ;;  %v943_v39 = vld [vmem:[%s4347_s10] sm:$0xff] }
 0x606   :  { %v3837_v40 = vpop.f32.mrf.mxu1 }
 0x608   :  { %v509_v41 = vpop.f32.mrf.mxu1 }
 0x60e   :  { %v3224_v42 = vpop.f32.mrf.mxu1 }
 0x60f   :  { %v606_v43 = vadd.f32 %v3224_v42, %v324_v9 }
 0x610   :  { %v600_v48 = vpop.f32.mrf.mxu1 }
 0x611   :  { %v601_v49 = vadd.f32 %v600_v48, %v323_v11  ;;  %v612_v50 = vsel %vm331_vm2, %v606_v43, -inf }
 0x612   :  { %613 = vmax.xlane.f32.xlu0 %v612_v50 }
 0x613   :  { %v609_v52 = vsel %vm331_vm2, %v601_v49, -inf }
 0x614   :  { %610 = vmax.xlane.f32.xlu1 %v609_v52 }
 0x69b   :  { %v614_v53 = vpop.xlane.xlu0 %613 }
 0x69c   :  { %v616_v54 = vsub.f32 %v606_v43, %v614_v53 }
 0x69d   :  { %v611_v55 = vpop.xlane.xlu1 %610 }
 0x69e   :  { %v619_v56 = vmul.f32 1.442695, %v616_v54  ;;  %v615_v57 = vsub.f32 %v601_v49, %v611_v55  ;;  %v2922_v54 = vld [vmem:[%s4348_s7] ss:$0 sm:$0xff] }
 0x6a0   :  { %3490 = vpow2.f32 %v619_v56  ;;  %v617_v59 = vmul.f32 1.442695, %v615_v57 }
 0x6a2   :  { %3492 = vpow2.f32 %v617_v59  ;;  %v1052_v59 = vld [vmem:[%s4349_s12 + $0x38] sm:$0xff] }
 0x6ad   :  { %v3491_v60 = vpop.eup %3490 }
 0x6ae   :  { %v624_v62 = vsel %vm331_vm2, %v3491_v60, 0.0 }
 0x6af   :  { %v3493_v63 = vpop.eup %3492  ;;  %625 = vadd.xlane.f32.xlu1 %v624_v62  ;;  %v1050_v62 = vld [vmem:[%s4349_s12 + $0x28] sm:$0xff] }
 0x6b0   :  { %v621_v0 = vsel %vm331_vm2, %v3493_v63, 0.0 }
 0x6b1   :  { %622 = vadd.xlane.f32.xlu0 %v621_v0  ;;  %v1048_v0 = vld [vmem:[%s4349_s12 + $0x18] sm:$0xff] }
 0x6c0   :  { %633 = vrot.lane.b32.xlu1 %v3809_v8, %s4368_s29  ;;  %v732_v8 = vld [vmem:[%s4344_s5 + $0x10] sm:$0xff] }
 0x6c7   :  { %635 = vrot.lane.b32.xlu0 %v3804_v7, %s4368_s29  ;;  %v733_v7 = vld [vmem:[%s4344_s5 + $0x18] sm:$0xff] }
 0x738   :  { %v626_v1 = vpop.xlane.xlu1 %625 }
 0x739   :  { %3494 = vrcp.f32 %v626_v1  ;;  %v1047_v1 = vld [vmem:[%s4349_s12 + $0x10] sm:$0xff] }
 0x73a   :  { %v623_v3 = vpop.xlane.xlu0 %622 }
 0x73b   :  { %3496 = vrcp.f32 %v623_v3  ;;  %v1046_v3 = vld [vmem:[%s4349_s12 + $0x8] sm:$0xff] }
 0x73c   :  { %v634_v5 = vpop.permute.xlu1 %633 }
 0x73e   :  { %v636_v4 = vpop.permute.xlu0 %635 }
 0x73f   :  { %3225 = vmatprep.subr.mxu0 %v636_v4 }
 0x740   :  { %3226 = vmatpush3.msra.mxu0 %v636_v4  ;;  %v1045_v4 = vld [vmem:[%s4349_s12] sm:$0xff] }
 0x741   :  { %3227 = vmatprep.subr.mxu0 %v634_v5 }
 0x742   :  { %3228 = vmatpush3.msra.mxu0 %v634_v5  ;;  %v2923_v5 = vld [vmem:[%s4350_s9] ss:$0 sm:$0xff] }
 0x743   :  { %3232 = vmatprep.subr.mxu0 %v733_v7 }
 0x746   :  { %v3495_v6 = vpop.eup %3494 }
 0x747   :  { %v630_v11 = vmul.f32 %v3495_v6, %v3491_v60  ;;  %v1051_v60 = vld [vmem:[%s4349_s12 + $0x30] sm:$0xff] }
 0x748   :  { %v3497_v9 = vpop.eup %3496 }
 0x749   :  { %v629_v10 = vmul.f32 %v3497_v9, %v3493_v63  ;;  %v1049_v63 = vld [vmem:[%s4349_s12 + $0x20] sm:$0xff] }
 0x74b   :  { %3229 = vmatprep.mubr.msk.f32.mxu0 %vm331_vm2, %v629_v10 }
 0x74c   :  { %3230 = vmatmul.mubr.msk.f32.vlgmr.msra.gmra.mxu0 %vm331_vm2, %v630_v11 }
 0x74d   :  { %3233 = vmatpush3.msra.mxu0 %v733_v7 }
 0x74e   :  { %3234 = vmatprep.subr.mxu0 %v732_v8 }
 0x74f   :  { %3235 = vmatpush3.msra.mxu0 %v732_v8 }
 0x750   :  { %3236 = vmatprep.subr.mxu0 %v731_v12 }
 0x751   :  { %3237 = vmatpush3.msra.mxu0 %v731_v12 }
 0x752   :  { %3238 = vmatprep.subr.mxu0 %v730_v13 }
 0x753   :  { %3239 = vmatpush3.msra.mxu0 %v730_v13 }
 0x80c   :  { %v3231_v16 = vpop.f32.mrf.mxu0 }
 0x80d   :  { %724 = vrot.lane.b32.xlu0 %v3231_v16, %s4366_s27 }
 0x80e   :  { %v711_v17 = vpop.f32.mrf.mxu0 }
 0x80f   :  { %722 = vrot.lane.b32.xlu1 %v711_v17, %s4366_s27 }
 0x87f   :  { %v725_v18 = vpop.permute.xlu0 %724 }
 0x880   :  { %v729_v21 = vsel %vm331_vm2, %v3837_v40, %v725_v18 }
 0x881   :  { %v723_v19 = vpop.permute.xlu1 %722 }
 0x882   :  { %v728_v20 = vsel %vm331_vm2, %v509_v41, %v723_v19 }
 0x883   :  { %3240 = vmatprep.mubr.msk.f32.mxu0 %vm174_vm1, %v728_v20 }
 0x884   :  { %3241 = vmatmul.mubr.msk.f32.vlgmr.msra.gmra.mxu0 %vm174_vm1, %v729_v21  ;;  %v2926_v21 = vld [vmem:[%s4351_s11] ss:$0 sm:$0xff] }
 0x944   :  { %v3242_v22 = vpop.f32.mrf.mxu0 }
 0x945   :  { %v816_v25 = vadd.f32 %v3242_v22, %v3716_v14  ;;  %v854_v14 = vld [vmem:[%s4346_s8 + $0x18] sm:$0xff] }
 0x946   :  { %v806_v26 = vpop.f32.mrf.mxu0  ;;  %3243 = vmatprep.subr.mxu1 %v854_v14 }
 0x947   :  { %v3872_v27 = vadd.f32 %v2921_v24, %v816_v25  ;;  %v815_v28 = vadd.f32 %v806_v26, %v3718_v15  ;;  %v946_v15 = vld [vmem:[%s4347_s10 + $0x18] sm:$0xff]  ;;  %3244 = vmatpush3.msra.mxu1 %v854_v14 }
 0x948   :  { %3254 = vmatprep.subr.mxu0 %v946_v15  ;;  %3245 = vmatprep.subr.mxu1 %v853_v34 }
 0x949   :  { %v3875_v29 = vadd.f32 %v2921_v24, %v815_v28  ;;  %v828_v30 = vmul.f32 %v3872_v27, %v3872_v27  ;;  %3255 = vmatpush3.msra.mxu0 %v946_v15  ;;  %3246 = vmatpush3.msra.mxu1 %v853_v34 }
 0x94a   :  { %3256 = vmatprep.subr.mxu0 %v945_v35  ;;  %3247 = vmatprep.subr.mxu1 %v852_v36 }
 0x94b   :  { %v832_v31 = vsel %vm174_vm1, %v828_v30, 0.0  ;;  %v827_v32 = vmul.f32 %v3875_v29, %v3875_v29  ;;  %3257 = vmatpush3.msra.mxu0 %v945_v35  ;;  %3248 = vmatpush3.msra.mxu1 %v852_v36 }
 0x94c   :  { %833 = vadd.xlane.f32.xlu0 %v832_v31  ;;  %3258 = vmatprep.subr.mxu0 %v944_v37 }
 0x94d   :  { %v829_v33 = vsel %vm174_vm1, %v827_v32, 0.0  ;;  %3259 = vmatpush3.msra.mxu0 %v944_v37  ;;  %3249 = vmatprep.subr.mxu1 %v851_v38 }
 0x94e   :  { %830 = vadd.xlane.f32.xlu1 %v829_v33  ;;  %3260 = vmatprep.subr.mxu0 %v943_v39  ;;  %v2933_v33 = vld [vmem:[%s4352_s13] ss:$0 sm:$0xff] }
 0x94f   :  { %3250 = vmatpush3.msra.mxu1 %v851_v38  ;;  %3261 = vmatpush3.msra.mxu0 %v943_v39 }
 0x950   :  { %3265 = vmatprep.subr.mxu1 %v1052_v59 }
 0x9d5   :  { %v834_v40 = vpop.xlane.xlu0 %833 }
 0x9d6   :  { %v836_v41 = vmul.f32 0.03125, %v834_v40 }
 0x9d7   :  { %v831_v42 = vpop.xlane.xlu1 %830 }
 0x9d8   :  { %v838_v43 = vadd.f32 1e-06, %v836_v41  ;;  %v835_v48 = vmul.f32 0.03125, %v831_v42  ;;  %v2941_v41 = vld [vmem:[%s4379_s30 + $0x68] sm:$0xff]  ;;  %v2940_v42 = vld [vmem:[%s4379_s30 + $0x60] sm:$0xff] }
 0x9da   :  { %3498 = vrsqrt.f32 %v838_v43  ;;  %v837_v49 = vadd.f32 1e-06, %v835_v48  ;;  %v2939_v43 = vld [vmem:[%s4379_s30 + $0x58] sm:$0xff]  ;;  %v2938_v48 = vld [vmem:[%s4379_s30 + $0x50] sm:$0xff] }
 0x9dc   :  { %3500 = vrsqrt.f32 %v837_v49  ;;  %v2937_v49 = vld [vmem:[%s4379_s30 + $0x48] sm:$0xff] }
 0x9e7   :  { %v3499_v50 = vpop.eup %3498 }
 0x9e8   :  { %v842_v53 = vmul.f32 %v3499_v50, %v3872_v27  ;;  %v2936_v50 = vld [vmem:[%s4379_s30 + $0x40] sm:$0xff] }
 0x9e9   :  { %v3501_v52 = vpop.eup %3500 }
 0x9ea   :  { %v841_v55 = vmul.f32 %v3501_v52, %v3875_v29  ;;  %v850_v57 = vmul.f32 %v2922_v54, %v842_v53 }
 0x9ec   :  { %v849_v56 = vmul.f32 %v2922_v54, %v841_v55 }
 0x9ee   :  { %3251 = vmatprep.mubr.msk.f32.mxu1 %vm174_vm1, %v849_v56  ;;  %3262 = vmatprep.mubr.msk.f32.mxu0 %vm174_vm1, %v849_v56 }
 0x9ef   :  { %3252 = vmatmul.mubr.msk.f32.vlgmr.msra.gmra.mxu1 %vm174_vm1, %v850_v57  ;;  %3263 = vmatmul.mubr.msk.f32.vlgmr.msra.gmra.mxu0 %vm174_vm1, %v850_v57 }
 0x9f0   :  { %1264 = vmatprep.mubr.f32.mxu0 %v3550_v23  ;;  %3266 = vmatpush3.msra.mxu1 %v1052_v59 }
 0x9f1   :  { %3267 = vmatprep.subr.mxu1 %v1051_v60 }
 0x9f2   :  { %3268 = vmatpush3.msra.mxu1 %v1051_v60 }
 0x9f3   :  { %3269 = vmatprep.subr.mxu1 %v1050_v62 }
 0x9f4   :  { %3270 = vmatpush3.msra.mxu1 %v1050_v62 }
 0x9f5   :  { %3271 = vmatprep.subr.mxu1 %v1049_v63 }
 0x9f6   :  { %3272 = vmatpush3.msra.mxu1 %v1049_v63  ;;  %v2935_v63 = vld [vmem:[%s4381_s3 + $0x1] ss:$0 sm:$0xff] }
 0x9f7   :  { %3273 = vmatprep.subr.mxu1 %v1048_v0 }
 0x9f8   :  { %3274 = vmatpush3.msra.mxu1 %v1048_v0 }
 0x9f9   :  { %3275 = vmatprep.subr.mxu1 %v1047_v1 }
 0x9fa   :  { %3276 = vmatpush3.msra.mxu1 %v1047_v1 }
 0x9fb   :  { %3277 = vmatprep.subr.mxu1 %v1046_v3 }
 0x9fc   :  { %3278 = vmatpush3.msra.mxu1 %v1046_v3 }
 0x9fd   :  { %3279 = vmatprep.subr.mxu1 %v1045_v4 }
 0x9fe   :  { %3280 = vmatpush3.msra.mxu1 %v1045_v4  ;;  %v2944_v4 = vld [vmem:[%s4382_s28 + $0x2] sm:$0x3] }
 0xaaf   :  { %v3253_v6 = vpop.f32.mrf.mxu1  ;;  %v3264_v18 = vpop.f32.mrf.mxu0 }
 0xab0   :  { %v940_v9 = vadd.f32 %v3253_v6, %v2923_v5  ;;  %v1026_v28 = vadd.f32 %v3264_v18, %v2926_v21 }
 0xab1   :  { %v934_v10 = vpop.f32.mrf.mxu1  ;;  %v1020_v20 = vpop.f32.mrf.mxu0 }
 0xab2   :  { %v2930_v11 = vmul.f32 -1.442695, %v940_v9  ;;  %v935_v7 = vadd.f32 %v2923_v5, %v934_v10  ;;  %v1021_v26 = vadd.f32 %v2926_v21, %v1020_v20  ;;  %v1187_v5 = vrot.slane %v2944_v4, %v210_v46 }
 0xab4   :  { %3502 = vpow2.f32 %v2930_v11  ;;  %v2929_v8 = vmul.f32 -1.442695, %v935_v7 }
 0xab6   :  { %3504 = vpow2.f32 %v2929_v8  ;;  %v1191_v8 = vrot.slane %v2944_v4, %v214_v2 }
 0xac1   :  { %v3503_v12 = vpop.eup %3502 }
 0xac2   :  { %v1036_v13 = vadd.f32 1.0, %v3503_v12 }
 0xac3   :  { %v3505_v16 = vpop.eup %3504 }
 0xac4   :  { %3506 = vrcp.f32 %v1036_v13  ;;  %v1035_v17 = vadd.f32 1.0, %v3505_v16 }
 0xac6   :  { %3508 = vrcp.f32 %v1035_v17 }
 0xad1   :  { %v3507_v19 = vpop.eup %3506 }
 0xad2   :  { %v1042_v24 = vmul.f32 %v3507_v19, %v940_v9 }
 0xad3   :  { %v3509_v22 = vpop.eup %3508 }
 0xad4   :  { %v1041_v25 = vmul.f32 %v3509_v22, %v935_v7  ;;  %v1044_v31 = vmul.f32 %v1042_v24, %v1026_v28 }
 0xad6   :  { %v1043_v30 = vmul.f32 %v1041_v25, %v1021_v26 }
 0xad8   :  { %3281 = vmatprep.mubr.msk.f32.mxu1 %vm1053_vm3, %v1043_v30 }
 0xad9   :  { %3282 = vmatmul.mubr.msk.f32.vlgmr.msra.gmra.mxu1 %vm1053_vm3, %v1044_v31 }
 0xb99   :  { %v3283_v32 = vpop.f32.mrf.mxu1 }
 0xb9a   :  { %v1136_v14 = vadd.f32 %v3283_v32, %v3872_v27  ;;  %v2943_v27 = vld [vmem:[%s4379_s30 + $0x78] sm:$0xff] }
 0xb9b   :  { %v1126_v15 = vpop.f32.mrf.mxu1  ;;  %1224 = vmatprep.subr.mxu0 %v2943_v27 }
 0xb9c   :  { %v3953_v34 = vadd.f32 %v2933_v33, %v1136_v14  ;;  %v1135_v35 = vadd.f32 %v1126_v15, %v3875_v29  ;;  %v2942_v29 = vld [vmem:[%s4379_s30 + $0x70] sm:$0xff] }
 0xb9d   :  { %1225 = vmatpush1.msra.mxu0 %v2942_v29 }
 0xb9e   :  { %v3956_v36 = vadd.f32 %v2933_v33, %v1135_v35  ;;  %v1149_v37 = vmul.f32 %v3953_v34, %v3953_v34  ;;  %1226 = vmatprep.subr.mxu0 %v2941_v41 }
 0xb9f   :  { %1227 = vmatpush1.msra.mxu0 %v2940_v42 }
 0xba0   :  { %v1153_v38 = vsel %vm174_vm1, %v1149_v37, 0.0  ;;  %v1148_v39 = vmul.f32 %v3956_v36, %v3956_v36  ;;  %1228 = vmatprep.subr.mxu0 %v2939_v43 }
 0xba1   :  { %1154 = vadd.xlane.f32.xlu1 %v1153_v38  ;;  %1229 = vmatpush1.msra.mxu0 %v2938_v48 }
 0xba2   :  { %v1150_v40 = vsel %vm174_vm1, %v1148_v39, 0.0  ;;  %1230 = vmatprep.subr.mxu0 %v2937_v49 }
 0xba3   :  { %1151 = vadd.xlane.f32.xlu0 %v1150_v40  ;;  %1231 = vmatpush1.msra.mxu0 %v2936_v50 }
 0xc2a   :  { %v1155_v52 = vpop.xlane.xlu1 %1154 }
 0xc2b   :  { %v1157_v53 = vmul.f32 0.03125, %v1155_v52 }
 0xc2c   :  { %v1152_v54 = vpop.xlane.xlu0 %1151 }
 0xc2d   :  { %v1159_v55 = vadd.f32 1e-06, %v1157_v53  ;;  %v1156_v56 = vmul.f32 0.03125, %v1152_v54 }
 0xc2f   :  { %v1158_v57 = vadd.f32 1e-06, %v1156_v56  ;;  %3510 = vrsqrt.f32 %v1159_v55 }
 0xc31   :  { %3512 = vrsqrt.f32 %v1158_v57 }
 0xc3c   :  { %v3511_v59 = vpop.eup %3510 }
 0xc3d   :  { %v1163_v1 = vmul.f32 %v3511_v59, %v3953_v34 }
 0xc3e   :  { %v3513_v60 = vpop.eup %3512 }
 0xc3f   :  { %v1162_v62 = vmul.f32 %v3513_v60, %v3956_v36  ;;  %v1171_v3 = vmul.f32 %v2935_v63, %v1163_v1 }
 0xc41   :  { %v1170_v0 = vmul.f32 %v2935_v63, %v1162_v62 }
 0xc43   :  { %2945 = vmatmul.mubr.msk.f32.vlgmr.msra.gmra.mxu0 %vm174_vm1, %v1170_v0 }
 0xc44   :  { %1270 = vmatprep.mubr.f32.mxu0 %v3550_v23 }
 0xc47   :  { %2946 = vmatmul.mubr.msk.f32.gmra.mxu0 %vm174_vm1, %v1171_v3 }
 0xd03   :  { %v1266_v6 = vpop.f32.mrf.mxu0 }
 0xd04   :  { %v1267_v9 = vadd.f32 %v1266_v6, %v1187_v5 }
 0xd05   :  { %v1268_v10 = vpop.f32.mrf.mxu0 }
 0xd06   :  { %v1279_v11 = vmul.f32 %v1267_v9, %v3778_v51  ;;  %v4008_v18 = vadd.f32 %v1268_v10, %v1191_v8  ;;  %v1277_v46 = vmul.f32 %v1267_v9, %v3787_v58 }
 0xd07   :  { %v1272_v7 = vpop.f32.mrf.mxu0 }
 0xd08   :  { %v1273_v12 = vadd.f32 %v1272_v7, %v1187_v5  ;;  %1283 = vrot.lane.b32.xlu1 %v1279_v11, %s3551_s0 }
 0xd09   :  { %v1274_v13 = vpop.f32.mrf.mxu0 }
 0xd0a   :  { %v1280_v16 = vmul.f32 %v1273_v12, %v3771_v47  ;;  %v4006_v17 = vadd.f32 %v1274_v13, %v1191_v8  ;;  %v1278_v47 = vmul.f32 %v1273_v12, %v3793_v61 }
 0xd0c   :  { %3291 = vmatprep.subr.mxu1 %v4006_v17  ;;  %1285 = vrot.lane.b32.xlu0 %v1280_v16, %s3551_s0  ;;  %s4384_s0 = smov 112   ;;  %v2962_v16 = vld [vmem:[%s4344_s5 + $0x38] sm:$0xff] }
 0xd0d   :  { %3292 = vmatpush3.msra.mxu1 %v4006_v17 }
 0xd0e   :  { %3293 = vmatprep.subr.mxu1 %v4008_v18 }
 0xd0f   :  { %3294 = vmatpush3.msra.mxu1 %v4008_v18 }
 0xd7a   :  { %v1284_v51 = vpop.permute.xlu1 %1283 }
 0xd7b   :  { %v1289_v2 = vadd.f32 %v1284_v51, %v1277_v46  ;;  %v2959_v46 = vld [vmem:[%s4344_s5 + $0x20] sm:$0xff] }
 0xd7d   :  { %1293 = vrot.lane.b32.xlu0 %v1289_v2, %s3552_s4  ;;  %3288 = vmatprep.mubr.msk.f32.mxu0 %vm331_vm2, %v1289_v2 }
 0xd7e   :  { %v1286_v19 = vpop.permute.xlu0 %1285 }
 0xd7f   :  { %v1290_v20 = vadd.f32 %v1286_v19, %v1278_v47 }
 0xd81   :  { %1295 = vrot.lane.b32.xlu1 %v1290_v20, %s3552_s4 }
 0xdef   :  { %v1294_v22 = vpop.permute.xlu0 %1293 }
 0xdf3   :  { %v1296_v21 = vpop.permute.xlu1 %1295 }
 0xdf4   :  { %3284 = vmatprep.subr.msk.mxu0 %vm331_vm2, %v1296_v21 }
 0xdf5   :  { %3285 = vmatpush3.xpose.msk.msra.mxu0 %vm331_vm2, %v1296_v21 }
 0xdf6   :  { %3286 = vmatprep.subr.msk.mxu0 %vm331_vm2, %v1294_v22 }
 0xdf9   :  { %3287 = vmatpush3.xpose.msk.msra.mxu0 %vm331_vm2, %v1294_v22 }
 0xdfc   :  { %3289 = vmatmul.mubr.msk.f32.vlgmr.msra.gmra.mxu0 %vm331_vm2, %v1290_v20 }
 0xebc   :  { %v3290_v58 = vpop.f32.mrf.mxu0 }
 0xebd   :  { %v1383_v24 = vsel %vm331_vm2, %v3290_v58, -inf }
 0xebe   :  { %1384 = vmax.xlane.f32.xlu0 %v1383_v24  ;;  %v1371_v61 = vpop.f32.mrf.mxu0 }
 0xebf   :  { %v1380_v25 = vsel %vm331_vm2, %v1371_v61, -inf }
 0xec0   :  { %1381 = vmax.xlane.f32.xlu1 %v1380_v25 }
 0xf47   :  { %v1385_v26 = vpop.xlane.xlu0 %1384 }
 0xf48   :  { %v1387_v28 = vsub.f32 %v3290_v58, %v1385_v26  ;;  %v2966_v58 = vld [vmem:[%s4345_s6 + $0x1] ss:$0 sm:$0xff] }
 0xf49   :  { %v1382_v30 = vpop.xlane.xlu1 %1381 }
 0xf4a   :  { %v1390_v31 = vmul.f32 1.442695, %v1387_v28  ;;  %v1386_v32 = vsub.f32 %v1371_v61, %v1382_v30 }
 0xf4c   :  { %3514 = vpow2.f32 %v1390_v31  ;;  %v1388_v33 = vmul.f32 1.442695, %v1386_v32 }
 0xf4e   :  { %3516 = vpow2.f32 %v1388_v33 }
 0xf59   :  { %v3515_v14 = vpop.eup %3514 }
 0xf5a   :  { %v1395_v15 = vsel %vm331_vm2, %v3515_v14, 0.0 }
 0xf5b   :  { %v3517_v35 = vpop.eup %3516  ;;  %1396 = vadd.xlane.f32.xlu1 %v1395_v15  ;;  %v2979_v15 = vld [vmem:[%s4347_s10 + $0x30] sm:$0xff] }
 0xf5c   :  { %v1392_v37 = vsel %vm331_vm2, %v3517_v35, 0.0 }
 0xf5d   :  { %1393 = vadd.xlane.f32.xlu0 %v1392_v37  ;;  %v2978_v37 = vld [vmem:[%s4347_s10 + $0x28] sm:$0xff] }
 0xf6c   :  { %1487 = vrot.lane.b32.xlu1 %v1289_v2, %s3553_s15 }
 0xf70   :  { %1483 = vrot.lane.b32.xlu1 %v1289_v2, %s4384_s0 }
 0xf73   :  { %1489 = vrot.lane.b32.xlu0 %v1290_v20, %s3553_s15 }
 0xf77   :  { %1485 = vrot.lane.b32.xlu0 %v1290_v20, %s4384_s0 }
 0xfe4   :  { %v1397_v38 = vpop.xlane.xlu1 %1396 }
 0xfe5   :  { %3518 = vrcp.f32 %v1397_v38  ;;  %v2969_v38 = vld [vmem:[%s4346_s8 + $0x20] sm:$0xff] }
 0xfe6   :  { %v1394_v39 = vpop.xlane.xlu0 %1393 }
 0xfe7   :  { %3520 = vrcp.f32 %v1394_v39  ;;  %v2977_v39 = vld [vmem:[%s4347_s10 + $0x20] sm:$0xff] }
 0xfe8   :  { %v1488_v27 = vpop.permute.xlu1 %1487 }
 0xfea   :  { %v1490_v40 = vpop.permute.xlu0 %1489 }
 0xfeb   :  { %3298 = vmatprep.subr.msk.mxu1 %vm331_vm2, %v1490_v40 }
 0xfec   :  { %v1484_v48 = vpop.permute.xlu1 %1483 }
 0xfee   :  { %v1486_v49 = vpop.permute.xlu0 %1485 }
 0xff2   :  { %v3519_v29 = vpop.eup %3518 }
 0xff3   :  { %v1401_v43 = vmul.f32 %v3519_v29, %v3515_v14  ;;  %v2971_v14 = vld [vmem:[%s4346_s8 + $0x30] sm:$0xff] }
 0xff4   :  { %v3521_v41 = vpop.eup %3520 }
 0xff5   :  { %v1400_v42 = vmul.f32 %v3521_v41, %v3517_v35  ;;  %v2970_v35 = vld [vmem:[%s4346_s8 + $0x28] sm:$0xff] }
 0xff7   :  { %3295 = vmatprep.mubr.msk.f32.mxu1 %vm331_vm2, %v1400_v42 }
 0xff8   :  { %3296 = vmatmul.mubr.msk.f32.vlgmr.msra.gmra.mxu1 %vm331_vm2, %v1401_v43 }
 0xff9   :  { %3299 = vmatpush3.xpose.msk.msra.mxu1 %vm331_vm2, %v1490_v40  ;;  %3302 = vmatprep.mubr.msk.f32.mxu1 %vm331_vm2, %v1484_v48 }
 0xffa   :  { %3300 = vmatprep.subr.msk.mxu1 %vm331_vm2, %v1488_v27 }
 0xffd   :  { %3301 = vmatpush3.xpose.msk.msra.mxu1 %vm331_vm2, %v1488_v27 }
0x1000   :  { %3303 = vmatmul.mubr.msk.f32.vlgmr.msra.gmra.mxu1 %vm331_vm2, %v1486_v49 }
0x10b8   :  { %v3297_v50 = vpop.f32.mrf.mxu1 }
0x10ba   :  { %v1474_v52 = vpop.f32.mrf.mxu1 }
0x10c0   :  { %v3304_v53 = vpop.f32.mrf.mxu1 }
0x10c1   :  { %v1577_v54 = vsel %vm331_vm2, %v3304_v53, -inf }
0x10c2   :  { %1578 = vmax.xlane.f32.xlu0 %v1577_v54  ;;  %v1565_v55 = vpop.f32.mrf.mxu1 }
0x10c3   :  { %v1574_v56 = vsel %vm331_vm2, %v1565_v55, -inf }
0x10c4   :  { %1575 = vmax.xlane.f32.xlu1 %v1574_v56  ;;  %v2994_v56 = vld [vmem:[%s4349_s12 + $0x78] sm:$0xff] }
0x114b   :  { %v1579_v57 = vpop.xlane.xlu0 %1578 }
0x114c   :  { %v1581_v59 = vsub.f32 %v3304_v53, %v1579_v57  ;;  %v2993_v57 = vld [vmem:[%s4349_s12 + $0x70] sm:$0xff] }
0x114d   :  { %v1576_v60 = vpop.xlane.xlu1 %1575 }
0x114e   :  { %v1584_v62 = vmul.f32 1.442695, %v1581_v59  ;;  %v1580_v63 = vsub.f32 %v1565_v55, %v1576_v60  ;;  %v2992_v59 = vld [vmem:[%s4349_s12 + $0x68] sm:$0xff]  ;;  %v2991_v60 = vld [vmem:[%s4349_s12 + $0x60] sm:$0xff] }
0x1150   :  { %3522 = vpow2.f32 %v1584_v62  ;;  %v1582_v0 = vmul.f32 1.442695, %v1580_v63  ;;  %v2990_v62 = vld [vmem:[%s4349_s12 + $0x58] sm:$0xff]  ;;  %v2989_v63 = vld [vmem:[%s4349_s12 + $0x50] sm:$0xff] }
0x1152   :  { %3524 = vpow2.f32 %v1582_v0  ;;  %v2988_v0 = vld [vmem:[%s4349_s12 + $0x48] sm:$0xff] }
0x115d   :  { %v3523_v1 = vpop.eup %3522 }
0x115e   :  { %v1589_v3 = vsel %vm331_vm2, %v3523_v1, 0.0 }
0x115f   :  { %v3525_v4 = vpop.eup %3524  ;;  %1590 = vadd.xlane.f32.xlu1 %v1589_v3  ;;  %v2974_v3 = vld [vmem:[%s4350_s9 + $0x1] ss:$0 sm:$0xff] }
0x1160   :  { %v1586_v5 = vsel %vm331_vm2, %v3525_v4, 0.0 }
0x1161   :  { %1587 = vadd.xlane.f32.xlu0 %v1586_v5 }
0x1170   :  { %1598 = vrot.lane.b32.xlu1 %v4008_v18, %s4384_s0  ;;  %v2960_v18 = vld [vmem:[%s4344_s5 + $0x28] sm:$0xff] }
0x1177   :  { %1600 = vrot.lane.b32.xlu0 %v4006_v17, %s4384_s0  ;;  %v2961_v17 = vld [vmem:[%s4344_s5 + $0x30] sm:$0xff] }
0x11e8   :  { %v1591_v6 = vpop.xlane.xlu1 %1590 }
0x11e9   :  { %3526 = vrcp.f32 %v1591_v6 }
0x11ea   :  { %v1588_v9 = vpop.xlane.xlu0 %1587 }
0x11eb   :  { %3528 = vrcp.f32 %v1588_v9 }
0x11ec   :  { %v1599_v11 = vpop.permute.xlu1 %1598 }
0x11ee   :  { %v1601_v10 = vpop.permute.xlu0 %1600 }
0x11ef   :  { %3305 = vmatprep.subr.mxu0 %v1601_v10 }
0x11f0   :  { %3306 = vmatpush3.msra.mxu0 %v1601_v10 }
0x11f1   :  { %3307 = vmatprep.subr.mxu0 %v1599_v11 }
0x11f2   :  { %3308 = vmatpush3.msra.mxu0 %v1599_v11 }
0x11f3   :  { %3312 = vmatprep.subr.mxu0 %v2962_v16 }
0x11f6   :  { %v3527_v7 = vpop.eup %3526 }
0x11f7   :  { %v1595_v13 = vmul.f32 %v3527_v7, %v3523_v1  ;;  %v2987_v1 = vld [vmem:[%s4349_s12 + $0x40] sm:$0xff] }
0x11f8   :  { %v3529_v8 = vpop.eup %3528 }
0x11f9   :  { %v1594_v12 = vmul.f32 %v3529_v8, %v3525_v4 }
0x11fb   :  { %3309 = vmatprep.mubr.msk.f32.mxu0 %vm331_vm2, %v1594_v12 }
0x11fc   :  { %3310 = vmatmul.mubr.msk.f32.vlgmr.msra.gmra.mxu0 %vm331_vm2, %v1595_v13 }
0x11fd   :  { %3313 = vmatpush3.msra.mxu0 %v2962_v16 }
0x11fe   :  { %3314 = vmatprep.subr.mxu0 %v2961_v17 }
0x11ff   :  { %3315 = vmatpush3.msra.mxu0 %v2961_v17 }
0x1200   :  { %3316 = vmatprep.subr.mxu0 %v2960_v18 }
0x1201   :  { %3317 = vmatpush3.msra.mxu0 %v2960_v18 }
0x1202   :  { %3318 = vmatprep.subr.mxu0 %v2959_v46 }
0x1203   :  { %3319 = vmatpush3.msra.mxu0 %v2959_v46  ;;  %v2982_v46 = vld [vmem:[%s4351_s11 + $0x1] ss:$0 sm:$0xff] }
0x12bc   :  { %v3311_v51 = vpop.f32.mrf.mxu0 }
0x12bd   :  { %1689 = vrot.lane.b32.xlu0 %v3311_v51, %s4385_s24 }
0x12be   :  { %v1676_v2 = vpop.f32.mrf.mxu0 }
0x12bf   :  { %1687 = vrot.lane.b32.xlu1 %v1676_v2, %s4385_s24 }
0x132f   :  { %v1690_v47 = vpop.permute.xlu0 %1689 }
0x1330   :  { %v1694_v21 = vsel %vm331_vm2, %v3297_v50, %v1690_v47 }
0x1331   :  { %v1688_v19 = vpop.permute.xlu1 %1687 }
0x1332   :  { %v1693_v20 = vsel %vm331_vm2, %v1474_v52, %v1688_v19  ;;  %v2968_v52 = vld [vmem:[%s4348_s7 + $0x1] ss:$0 sm:$0xff] }
0x1333   :  { %3320 = vmatprep.mubr.msk.f32.mxu0 %vm174_vm1, %v1693_v20 }
0x1334   :  { %3321 = vmatmul.mubr.msk.f32.vlgmr.msra.gmra.mxu0 %vm174_vm1, %v1694_v21 }
0x13f4   :  { %v3322_v22 = vpop.f32.mrf.mxu0 }
0x13f5   :  { %v1782_v24 = vadd.f32 %v3322_v22, %v3953_v34  ;;  %v2972_v34 = vld [vmem:[%s4346_s8 + $0x38] sm:$0xff] }
0x13f6   :  { %v1772_v61 = vpop.f32.mrf.mxu0  ;;  %3323 = vmatprep.subr.mxu1 %v2972_v34 }
0x13f7   :  { %v4073_v25 = vadd.f32 %v2966_v58, %v1782_v24  ;;  %v1781_v26 = vadd.f32 %v1772_v61, %v3956_v36  ;;  %v2980_v36 = vld [vmem:[%s4347_s10 + $0x38] sm:$0xff]  ;;  %3324 = vmatpush3.msra.mxu1 %v2972_v34  ;;  %v2998_v24 = vld [vmem:[%s4352_s13 + $0x1] ss:$0 sm:$0xff] }
0x13f8   :  { %3334 = vmatprep.subr.mxu0 %v2980_v36  ;;  %3325 = vmatprep.subr.mxu1 %v2971_v14 }
0x13f9   :  { %v4076_v28 = vadd.f32 %v2966_v58, %v1781_v26  ;;  %v1796_v30 = vmul.f32 %v4073_v25, %v4073_v25  ;;  %3335 = vmatpush3.msra.mxu0 %v2980_v36  ;;  %3326 = vmatpush3.msra.mxu1 %v2971_v14 }
0x13fa   :  { %3336 = vmatprep.subr.mxu0 %v2979_v15  ;;  %3327 = vmatprep.subr.mxu1 %v2970_v35 }
0x13fb   :  { %v1800_v31 = vsel %vm174_vm1, %v1796_v30, 0.0  ;;  %v1795_v32 = vmul.f32 %v4076_v28, %v4076_v28  ;;  %3337 = vmatpush3.msra.mxu0 %v2979_v15  ;;  %3328 = vmatpush3.msra.mxu1 %v2970_v35  ;;  %v2226_v15 = vld [vmem:[%s4353_s18 + $0x8] sm:$0xff] }
0x13fc   :  { %1801 = vadd.xlane.f32.xlu0 %v1800_v31  ;;  %3338 = vmatprep.subr.mxu0 %v2978_v37 }
0x13fd   :  { %v1797_v33 = vsel %vm174_vm1, %v1795_v32, 0.0  ;;  %3339 = vmatpush3.msra.mxu0 %v2978_v37  ;;  %3329 = vmatprep.subr.mxu1 %v2969_v38 }
0x13fe   :  { %1798 = vadd.xlane.f32.xlu1 %v1797_v33  ;;  %3340 = vmatprep.subr.mxu0 %v2977_v39 }
0x13ff   :  { %3330 = vmatpush3.msra.mxu1 %v2969_v38  ;;  %3341 = vmatpush3.msra.mxu0 %v2977_v39 }
0x1400   :  { %3364 = vmatprep.subr.mxu0 %v3550_v23  ;;  %3345 = vmatprep.subr.mxu1 %v2994_v56 }
0x1485   :  { %v1802_v40 = vpop.xlane.xlu0 %1801 }
0x1486   :  { %v1804_v27 = vmul.f32 0.03125, %v1802_v40 }
0x1487   :  { %v1799_v29 = vpop.xlane.xlu1 %1798 }
0x1488   :  { %v1806_v41 = vadd.f32 1e-06, %v1804_v27  ;;  %v1803_v42 = vmul.f32 0.03125, %v1799_v29  ;;  %v2145_v29 = vand.u32 127, %v208_v44 }
0x148a   :  { %3530 = vrsqrt.f32 %v1806_v41  ;;  %v1805_v43 = vadd.f32 1e-06, %v1803_v42  ;;  %v2148_v41 = vmul.u32 4, %v3768_v45  ;;  %v3007_v45 = vld [vmem:[%s4353_s18 + $0x38] sm:$0xff] }
0x148c   :  { %3532 = vrsqrt.f32 %v1805_v43  ;;  %v2999_v43 = vld [vmem:[%s4354_s17] ss:$0 sm:$0xff]  ;;  %vm2149_vm5 = vcmp.eq.s32.totalorder %v2145_v29, %v2148_v41 }
0x1497   :  { %v3531_v48 = vpop.eup %3530 }
0x1498   :  { %v1810_v50 = vmul.f32 %v3531_v48, %v4073_v25 }
0x1499   :  { %v3533_v49 = vpop.eup %3532 }
0x149a   :  { %v1809_v53 = vmul.f32 %v3533_v49, %v4076_v28  ;;  %v1818_v55 = vmul.f32 %v2968_v52, %v1810_v50  ;;  %v2229_v50 = vadd.s32 1, %v2148_v41 }
0x149c   :  { %v1817_v54 = vmul.f32 %v2968_v52, %v1809_v53  ;;  %vm2230_vm6 = vcmp.eq.s32.totalorder %v2145_v29, %v2229_v50 }
0x149d   :  { %v3002_v44 = vsel %vm2230_vm6, 1.0, %v3550_v23 }
0x149e   :  { %3331 = vmatprep.mubr.msk.f32.mxu1 %vm174_vm1, %v1817_v54  ;;  %3342 = vmatprep.mubr.msk.f32.mxu0 %vm174_vm1, %v1817_v54 }
0x149f   :  { %3332 = vmatmul.mubr.msk.f32.vlgmr.msra.gmra.mxu1 %vm174_vm1, %v1818_v55  ;;  %3343 = vmatmul.mubr.msk.f32.vlgmr.msra.gmra.mxu0 %vm174_vm1, %v1818_v55  ;;  %v3000_v55 = vsel %vm2149_vm5, 1.0, %v3550_v23 }
0x14a0   :  { %3346 = vmatpush3.msra.mxu1 %v2994_v56  ;;  %3368 = vmatprep.mubr.msk.f32.mxu0 %vm3556_vm4, %v3550_v23  ;;  %v3006_v56 = vld [vmem:[%s4353_s18 + $0x30] sm:$0xff] }
0x14a1   :  { %3347 = vmatprep.subr.mxu1 %v2993_v57 }
0x14a2   :  { %3348 = vmatpush3.msra.mxu1 %v2993_v57  ;;  %v2225_v57 = vld [vmem:[%s4353_s18] sm:$0xff] }
0x14a3   :  { %3349 = vmatprep.subr.mxu1 %v2992_v59 }
0x14a4   :  { %3350 = vmatpush3.msra.mxu1 %v2992_v59  ;;  %v3005_v59 = vld [vmem:[%s4353_s18 + $0x28] sm:$0xff] }
0x14a5   :  { %3351 = vmatprep.subr.mxu1 %v2991_v60 }
0x14a6   :  { %3352 = vmatpush3.msra.mxu1 %v2991_v60  ;;  %v3004_v60 = vld [vmem:[%s4353_s18 + $0x20] sm:$0xff] }
0x14a7   :  { %3353 = vmatprep.subr.mxu1 %v2990_v62 }
0x14a8   :  { %3354 = vmatpush3.msra.mxu1 %v2990_v62  ;;  %v2457_v62 = vadd.s32 2, %v2148_v41 }
0x14a9   :  { %3355 = vmatprep.subr.mxu1 %v2989_v63 }
0x14aa   :  { %3356 = vmatpush3.msra.mxu1 %v2989_v63  ;;  %vm2458_vm7 = vcmp.eq.s32.totalorder %v2145_v29, %v2457_v62 }
0x14ab   :  { %3357 = vmatprep.subr.mxu1 %v2988_v0 }
0x14ac   :  { %3358 = vmatpush3.msra.mxu1 %v2988_v0 }
0x14ad   :  { %3359 = vmatprep.subr.mxu1 %v2987_v1 }
0x14ae   :  { %3360 = vmatpush3.msra.mxu1 %v2987_v1  ;;  %v2613_v1 = vadd.s32 3, %v2148_v41 }
0x14af   :  { %3389 = vmatprep.subr.mxu1 %v3550_v23 }
0x14b0   :  { %vm2614_vm8 = vcmp.eq.s32.totalorder %v2145_v29, %v2613_v1 }
0x155f   :  { %v3333_v4 = vpop.f32.mrf.mxu1  ;;  %v3344_v16 = vpop.f32.mrf.mxu0 }
0x1560   :  { %v1910_v5 = vadd.f32 %v3333_v4, %v2974_v3  ;;  %v1998_v20 = vadd.f32 %v3344_v16, %v2982_v46  ;;  %v3019_v16 = vld [vmem:[%s4353_s18 + $0x60] sm:$0xff] }
0x1561   :  { %v1904_v6 = vpop.f32.mrf.mxu1  ;;  %v1992_v18 = vpop.f32.mrf.mxu0 }
0x1562   :  { %v2986_v9 = vmul.f32 -1.442695, %v1910_v5  ;;  %v1905_v10 = vadd.f32 %v2974_v3, %v1904_v6  ;;  %v1993_v19 = vadd.f32 %v2982_v46, %v1992_v18  ;;  %v3017_v6 = vsel %vm2614_vm8, 1.0, %v3550_v23 }
0x1564   :  { %3534 = vpow2.f32 %v2986_v9  ;;  %v2985_v11 = vmul.f32 -1.442695, %v1905_v10  ;;  %v3015_v9 = vld [vmem:[%s4353_s18 + $0x58] sm:$0xff] }
0x1566   :  { %3536 = vpow2.f32 %v2985_v11  ;;  %v3013_v11 = vld [vmem:[%s4353_s18 + $0x48] sm:$0xff] }
0x1571   :  { %v3535_v7 = vpop.eup %3534 }
0x1572   :  { %v2008_v8 = vadd.f32 1.0, %v3535_v7  ;;  %v3022_v7 = vld [vmem:[%s4353_s18 + $0x78] sm:$0xff] }
0x1573   :  { %v3537_v12 = vpop.eup %3536 }
0x1574   :  { %3538 = vrcp.f32 %v2008_v8  ;;  %v2007_v13 = vadd.f32 1.0, %v3537_v12  ;;  %v3012_v8 = vld [vmem:[%s4353_s18 + $0x40] sm:$0xff]  ;;  %v3021_v12 = vld [vmem:[%s4353_s18 + $0x70] sm:$0xff] }
0x1576   :  { %3540 = vrcp.f32 %v2007_v13  ;;  %v3020_v13 = vld [vmem:[%s4353_s18 + $0x68] sm:$0xff] }
0x1581   :  { %v3539_v17 = vpop.eup %3538 }
0x1582   :  { %v2014_v2 = vmul.f32 %v3539_v17, %v1910_v5  ;;  %v3010_v5 = vsel %vm2458_vm7, 1.0, %v3550_v23 }
0x1583   :  { %v3541_v51 = vpop.eup %3540 }
0x1584   :  { %v2013_v47 = vmul.f32 %v3541_v51, %v1905_v10  ;;  %v2016_v22 = vmul.f32 %v2014_v2, %v1998_v20  ;;  %v3014_v10 = vld [vmem:[%s4353_s18 + $0x50] sm:$0xff] }
0x1586   :  { %v2015_v21 = vmul.f32 %v2013_v47, %v1993_v19 }
0x1588   :  { %3361 = vmatprep.mubr.msk.f32.mxu1 %vm1053_vm3, %v2015_v21 }
0x1589   :  { %3362 = vmatmul.mubr.msk.f32.vlgmr.msra.gmra.mxu1 %vm1053_vm3, %v2016_v22  ;;  %v2819_v22 = vld [vmem:[%s4355_s20 + $0x78] sm:$0xff] }
0x158a   :  { %3397 = vmatprep.mubr.msk.f32.mxu1 %vm3556_vm4, %v3550_v23 }
0x1649   :  { %v3363_v58 = vpop.f32.mrf.mxu1 }
0x164a   :  { %v2108_v61 = vadd.f32 %v3363_v58, %v4073_v25  ;;  %v2228_v25 = vld [vmem:[%s4353_s18 + $0x18] sm:$0xff]  ;;  %v2818_v58 = vld [vmem:[%s4355_s20 + $0x70] sm:$0xff] }
0x164b   :  { %v2098_v26 = vpop.f32.mrf.mxu1  ;;  %3390 = vmatpush3.msra.mxu1 %v2228_v25  ;;  %v2807_v25 = vld [vmem:[%s4355_s20 + $0x18] sm:$0xff] }
0x164c   :  { %v2118_v30 = vadd.f32 %v2998_v24, %v2108_v61  ;;  %v2107_v31 = vadd.f32 %v2098_v26, %v4076_v28  ;;  %v2227_v28 = vld [vmem:[%s4353_s18 + $0x10] sm:$0xff]  ;;  %3391 = vmatprep.subr.mxu1 %v3550_v23  ;;  %v2816_v61 = vld [vmem:[%s4355_s20 + $0x60] sm:$0xff]  ;;  %v2815_v26 = vld [vmem:[%s4355_s20 + $0x58] sm:$0xff] }
0x164d   :  { %3392 = vmatpush3.msra.mxu1 %v2227_v28  ;;  %v2806_v28 = vld [vmem:[%s4355_s20 + $0x10] sm:$0xff] }
0x164e   :  { %v2117_v32 = vadd.f32 %v2998_v24, %v2107_v31  ;;  %v2121_v33 = vmul.f32 %v2118_v30, %v2118_v30  ;;  %3393 = vmatprep.subr.mxu1 %v3550_v23  ;;  %v2817_v24 = vld [vmem:[%s4355_s20 + $0x68] sm:$0xff] }
0x164f   :  { %3394 = vmatpush3.msra.mxu1 %v2226_v15  ;;  %v2813_v31 = vld [vmem:[%s4355_s20 + $0x48] sm:$0xff] }
0x1650   :  { %v2125_v34 = vsel %vm174_vm1, %v2121_v33, 0.0  ;;  %v2120_v36 = vmul.f32 %v2117_v32, %v2117_v32  ;;  %3395 = vmatprep.subr.mxu1 %v3550_v23  ;;  %v2811_v33 = vld [vmem:[%s4355_s20 + $0x38] sm:$0xff]  ;;  %v2805_v15 = vld [vmem:[%s4355_s20 + $0x8] sm:$0xff] }
0x1651   :  { %2126 = vadd.xlane.f32.xlu0 %v2125_v34  ;;  %3396 = vmatpush3.msra.mxu1 %v2225_v57  ;;  %v2810_v34 = vld [vmem:[%s4355_s20 + $0x30] sm:$0xff] }
0x1652   :  { %v2122_v14 = vsel %vm174_vm1, %v2120_v36, 0.0  ;;  %3407 = vmatprep.subr.mxu1 %v3550_v23  ;;  %v2809_v36 = vld [vmem:[%s4355_s20 + $0x28] sm:$0xff] }
0x1653   :  { %2123 = vadd.xlane.f32.xlu1 %v2122_v14  ;;  %v2808_v14 = vld [vmem:[%s4355_s20 + $0x20] sm:$0xff] }
0x16da   :  { %v2127_v35 = vpop.xlane.xlu0 %2126 }
0x16db   :  { %v2129_v37 = vmul.f32 0.03125, %v2127_v35  ;;  %v2804_v35 = vld [vmem:[%s4355_s20] sm:$0xff] }
0x16dc   :  { %v2124_v38 = vpop.xlane.xlu1 %2123 }
0x16dd   :  { %v2131_v39 = vadd.f32 1e-06, %v2129_v37  ;;  %v2128_v40 = vmul.f32 0.03125, %v2124_v38 }
0x16df   :  { %3542 = vrsqrt.f32 %v2131_v39  ;;  %v2130_v27 = vadd.f32 1e-06, %v2128_v40 }
0x16e1   :  { %3544 = vrsqrt.f32 %v2130_v27  ;;  %v3024_v27 = vld [vmem:[%s4356_s19] ss:$0 sm:$0xff] }
0x16ec   :  { %v3543_v42 = vpop.eup %3542 }
0x16ed   :  { %v2135_v48 = vmul.f32 %v3543_v42, %v2118_v30  ;;  %v2814_v30 = vld [vmem:[%s4355_s20 + $0x50] sm:$0xff] }
0x16ee   :  { %v3545_v49 = vpop.eup %3544 }
0x16ef   :  { %v2143_v52 = vmul.f32 %v2999_v43, %v2135_v48  ;;  %v2134_v53 = vmul.f32 %v3545_v49, %v2117_v32  ;;  %v2812_v32 = vld [vmem:[%s4355_s20 + $0x40] sm:$0xff] }
0x16f1   :  { %3365 = vmatpush3.msra.mxu0 %v2143_v52  ;;  %v2142_v54 = vmul.f32 %v2999_v43, %v2134_v53 }
0x16f2   :  { %3366 = vmatprep.subr.mxu0 %v3550_v23 }
0x16f3   :  { %3367 = vmatpush3.msra.mxu0 %v2142_v54 }
0x16f4   :  { %3369 = vmatmul.mubr.msk.f32.vlgmr.msra.gmra.mxu0 %vm331_vm2, %v3000_v55  ;;  %3371 = vmatprep.subr.mxu0 %v3550_v23 }
0x16f5   :  { %3372 = vmatpush3.msra.mxu0 %v2143_v52  ;;  %3375 = vmatprep.mubr.msk.f32.mxu0 %vm3556_vm4, %v3550_v23 }
0x16f6   :  { %3373 = vmatprep.subr.mxu0 %v3550_v23 }
0x16f7   :  { %3374 = vmatpush3.msra.mxu0 %v2142_v54 }
0x16f8   :  { %3376 = vmatmul.mubr.msk.f32.vlgmr.msra.gmra.mxu0 %vm331_vm2, %v3002_v44  ;;  %3378 = vmatprep.subr.mxu0 %v3550_v23 }
0x16f9   :  { %3379 = vmatpush3.msra.mxu0 %v3007_v45  ;;  %3386 = vmatprep.mubr.msk.f32.mxu0 %vm3556_vm4, %v3550_v23 }
0x16fa   :  { %3380 = vmatprep.subr.mxu0 %v3550_v23 }
0x16fb   :  { %3381 = vmatpush3.msra.mxu0 %v3006_v56 }
0x16fc   :  { %3382 = vmatprep.subr.mxu0 %v3550_v23 }
0x16fd   :  { %3383 = vmatpush3.msra.mxu0 %v3005_v59 }
0x16fe   :  { %3384 = vmatprep.subr.mxu0 %v3550_v23 }
0x16ff   :  { %3385 = vmatpush3.msra.mxu0 %v3004_v60 }
0x1700   :  { %3400 = vmatprep.subr.mxu0 %v3550_v23 }
0x17b4   :  { %v2221_v63 = vpop.f32.mrf.mxu0 }
0x17b5   :  { %3398 = vmatmul.mubr.msk.f32.vlgmr.msra.gmra.mxu1 %vm174_vm1, %v2221_v63 }
0x17b6   :  { %v3370_v0 = vpop.f32.mrf.mxu0  ;;  %3415 = vmatprep.mubr.msk.f32.mxu1 %vm3556_vm4, %v3550_v23  ;;  %3408 = vmatpush3.msra.mxu1 %v3015_v9 }
0x17b7   :  { %3409 = vmatprep.subr.mxu1 %v3550_v23 }
0x17b8   :  { %v2302_v3 = vpop.f32.mrf.mxu0  ;;  %3410 = vmatpush3.msra.mxu1 %v3014_v10 }
0x17b9   :  { %3387 = vmatmul.mubr.msk.f32.vlgmr.msra.gmra.mxu0 %vm174_vm1, %v2302_v3  ;;  %3411 = vmatprep.subr.mxu1 %v3550_v23 }
0x17ba   :  { %3401 = vmatpush3.msra.mxu0 %v2143_v52  ;;  %v3377_v4 = vpop.f32.mrf.mxu0  ;;  %3404 = vmatprep.mubr.msk.f32.mxu0 %vm3556_vm4, %v3550_v23 }
0x17bb   :  { %3402 = vmatprep.subr.mxu0 %v3550_v23  ;;  %3412 = vmatpush3.msra.mxu1 %v3013_v11  ;;  %v3025_v11 = vld [vmem:[%s4357_s21] ss:$0 sm:$0xff] }
0x17bc   :  { %3403 = vmatpush3.msra.mxu0 %v2142_v54  ;;  %3413 = vmatprep.subr.mxu1 %v3550_v23 }
0x17bd   :  { %3418 = vmatprep.subr.mxu0 %v3550_v23  ;;  %3405 = vmatmul.mubr.msk.f32.vlgmr.msra.gmra.mxu0 %vm331_vm2, %v3010_v5 }
0x17be   :  { %3419 = vmatpush3.msra.mxu0 %v2143_v52  ;;  %3422 = vmatprep.mubr.msk.f32.mxu0 %vm3556_vm4, %v3550_v23 }
0x17bf   :  { %3420 = vmatprep.subr.mxu0 %v3550_v23  ;;  %3414 = vmatpush3.msra.mxu1 %v3012_v8 }
0x17c0   :  { %3421 = vmatpush3.msra.mxu0 %v2142_v54  ;;  %3436 = vmatprep.subr.mxu1 %v3550_v23 }
0x17c1   :  { %3423 = vmatmul.mubr.msk.f32.vlgmr.msra.gmra.mxu0 %vm331_vm2, %v3017_v6  ;;  %3425 = vmatprep.subr.mxu0 %v3550_v23 }
0x17c2   :  { %3433 = vmatprep.mubr.msk.f32.mxu0 %vm3556_vm4, %v3550_v23  ;;  %3426 = vmatpush3.msra.mxu0 %v3022_v7 }
0x17c3   :  { %3427 = vmatprep.subr.mxu0 %v3550_v23 }
0x17c4   :  { %3428 = vmatpush3.msra.mxu0 %v3021_v12 }
0x17c5   :  { %3429 = vmatprep.subr.mxu0 %v3550_v23 }
0x17c6   :  { %3430 = vmatpush3.msra.mxu0 %v3020_v13 }
0x17c7   :  { %3431 = vmatprep.subr.mxu0 %v3550_v23 }
0x17c8   :  { %3432 = vmatpush3.msra.mxu0 %v3019_v16 }
0x1875   :  { %v2453_v17 = vpop.f32.mrf.mxu1 }
0x1877   :  { %v3399_v18 = vpop.f32.mrf.mxu1 }
0x1879   :  { %v2380_v46 = vpop.f32.mrf.mxu0 }
0x187a   :  { %v2454_v51 = vadd.f32 %v2453_v17, %v2380_v46 }
0x187b   :  { %v3388_v2 = vpop.f32.mrf.mxu0 }
0x187d   :  { %v2530_v47 = vpop.f32.mrf.mxu0 }
0x187e   :  { %3416 = vmatmul.mubr.msk.f32.vlgmr.msra.gmra.mxu1 %vm174_vm1, %v2530_v47 }
0x187f   :  { %v3406_v19 = vpop.f32.mrf.mxu0  ;;  %3468 = vmatprep.mubr.msk.f32.mxu1 %vm3556_vm4, %v3550_v23  ;;  %3437 = vmatpush3.msra.mxu1 %v2819_v22 }
0x1880   :  { %3438 = vmatprep.subr.mxu1 %v3550_v23 }
0x1881   :  { %v2686_v20 = vpop.f32.mrf.mxu0  ;;  %3439 = vmatpush3.msra.mxu1 %v2818_v58 }
0x1882   :  { %3434 = vmatmul.mubr.msk.f32.vlgmr.msra.gmra.mxu0 %vm174_vm1, %v2686_v20  ;;  %3440 = vmatprep.subr.mxu1 %v3550_v23 }
0x1883   :  { %v3424_v21 = vpop.f32.mrf.mxu0  ;;  %3441 = vmatpush3.msra.mxu1 %v2817_v24 }
0x1884   :  { %3442 = vmatprep.subr.mxu1 %v3550_v23 }
0x1885   :  { %3443 = vmatpush3.msra.mxu1 %v2816_v61 }
0x1886   :  { %3444 = vmatprep.subr.mxu1 %v3550_v23 }
0x1887   :  { %3445 = vmatpush3.msra.mxu1 %v2815_v26 }
0x1888   :  { %3446 = vmatprep.subr.mxu1 %v3550_v23 }
0x1889   :  { %3447 = vmatpush3.msra.mxu1 %v2814_v30 }
0x188a   :  { %3448 = vmatprep.subr.mxu1 %v3550_v23 }
0x188b   :  { %3449 = vmatpush3.msra.mxu1 %v2813_v31 }
0x188c   :  { %3450 = vmatprep.subr.mxu1 %v3550_v23 }
0x188d   :  { %3451 = vmatpush3.msra.mxu1 %v2812_v32 }
0x188e   :  { %3452 = vmatprep.subr.mxu1 %v3550_v23 }
0x188f   :  { %3453 = vmatpush3.msra.mxu1 %v2811_v33 }
0x1890   :  { %3454 = vmatprep.subr.mxu1 %v3550_v23 }
0x1891   :  { %3455 = vmatpush3.msra.mxu1 %v2810_v34 }
0x1892   :  { %3456 = vmatprep.subr.mxu1 %v3550_v23 }
0x1893   :  { %3457 = vmatpush3.msra.mxu1 %v2809_v36 }
0x1894   :  { %3458 = vmatprep.subr.mxu1 %v3550_v23 }
0x1895   :  { %3459 = vmatpush3.msra.mxu1 %v2808_v14 }
0x1896   :  { %3460 = vmatprep.subr.mxu1 %v3550_v23 }
0x1897   :  { %3461 = vmatpush3.msra.mxu1 %v2807_v25 }
0x1898   :  { %3462 = vmatprep.subr.mxu1 %v3550_v23 }
0x1899   :  { %3463 = vmatpush3.msra.mxu1 %v2806_v28 }
0x189a   :  { %3464 = vmatprep.subr.mxu1 %v3550_v23 }
0x189b   :  { %3465 = vmatpush3.msra.mxu1 %v2805_v15 }
0x189c   :  { %3466 = vmatprep.subr.mxu1 %v3550_v23 }
0x189d   :  { %3467 = vmatpush3.msra.mxu1 %v2804_v35 }
0x193e   :  { %v2608_v37 = vpop.f32.mrf.mxu1 }
0x193f   :  { %v2612_v39 = vadd.f32 %v2608_v37, %v2454_v51 }
0x1940   :  { %v3417_v38 = vpop.f32.mrf.mxu1 }
0x1942   :  { %v2764_v40 = vpop.f32.mrf.mxu0 }
0x1943   :  { %v2768_v29 = vadd.f32 %v2764_v40, %v2612_v39 }
0x1944   :  { %v3435_v41 = vpop.f32.mrf.mxu0 }
0x1945   :  { %v2776_v42 = vadd.f32 %v3024_v27, %v2768_v29 }
0x1947   :  { %v2777_v43 = vmul.f32 0.70710677, %v2776_v42  ;;  %v2801_v6 = vmul.f32 0.5, %v2776_v42 }
0x1949   :  { %v2778_v48 = vand.u32 2147483647, %v2777_v43  ;;  %vm2798_vm9 = vcmp.ge.f32.partialorder %v2777_v43, 0.0 }
0x194b   :  { %v2779_v49 = vmul.f32 0.3275911, %v2778_v48  ;;  %v2792_v52 = vsub.f32 0.0, %v2778_v48 }
0x194d   :  { %v2780_v50 = vadd.f32 1.0, %v2779_v49  ;;  %v2793_v53 = vmul.f32 %v2792_v52, %v2778_v48 }
0x194f   :  { %3546 = vrcp.f32 %v2780_v50  ;;  %v2794_v55 = vmul.f32 1.442695, %v2793_v53 }
0x1951   :  { %3548 = vpow2.f32 %v2794_v55 }
0x195c   :  { %v3547_v23 = vpop.eup %3546 }
0x195d   :  { %v2783_v54 = vmul.f32 1.0614054, %v3547_v23 }
0x195e   :  { %v3549_v0 = vpop.eup %3548 }
0x195f   :  { %v2784_v44 = vadd.f32 -1.4531521, %v2783_v54 }
0x1961   :  { %v2785_v45 = vmul.f32 %v3547_v23, %v2784_v44 }
0x1963   :  { %v2786_v56 = vadd.f32 1.4214138, %v2785_v45 }
0x1965   :  { %v2787_v57 = vmul.f32 %v3547_v23, %v2786_v56 }
0x1967   :  { %v2788_v59 = vadd.f32 -0.28449672, %v2787_v57 }
0x1969   :  { %v2789_v60 = vmul.f32 %v3547_v23, %v2788_v59 }
0x196b   :  { %v2790_v62 = vadd.f32 0.2548296, %v2789_v60 }
0x196d   :  { %v2791_v63 = vmul.f32 %v3547_v23, %v2790_v62 }
0x196f   :  { %v2796_v1 = vmul.f32 %v3549_v0, %v2791_v63 }
0x1971   :  { %v2797_v3 = vsub.f32 1.0, %v2796_v1 }
0x1973   :  { %v2799_v4 = vsub.f32 0.0, %v2797_v3 }
0x1975   :  { %v2800_v5 = vsel %vm2798_vm9, %v2797_v3, %v2799_v4 }
0x1976   :  { %v2802_v9 = vadd.f32 1.0, %v2800_v5 }
0x1978   :  { %v2803_v10 = vmul.f32 %v2802_v9, %v2801_v6 }
0x197a   :  { %3469 = vmatmul.mubr.f32.vlgmr.msra.gmra.mxu1 %v2803_v10 }
0x1a3a   :  { %v2893_v7 = vpop.f32.mrf.mxu1 }
0x1a3b   :  { %v2894_v8 = vadd.f32 %v3025_v11, %v2893_v7 }
0x1a3c   :  { %v3470_v12 = vpop.f32.mrf.mxu1 }
0x1a3d   :  { %2897 = vst [vmem:[%s4358_s22] sm:$0xf] %v2894_v8 }

</bundles_post_ra>
